<compile_context>
chip_gen: v7x
topology: tpu7x:2x2x1
jax: 0.10.0
libtpu: 0.0.40
codegen_flags: <defaults>
</compile_context>

<pallas_src>
import functools

import jax
import jax.numpy as jnp
from jax.experimental import pallas as pl
from jax.experimental.pallas import tpu as pltpu

_P_PAD = 8  # xyz (3) padded to 8 so the positional matmul contraction is aligned


def _self_attention_kernel(
    patches_ref, feature_ref,
    wkv_ref, bkv_ref,
    wpe1_ref, bpe1_ref, wpe2_ref, bpe2_ref,
    wwe1_ref, bwe1_ref, wwe2_ref, bwe2_ref,
    wr_ref, br_ref,
    out_ref,
    *, K, C,
):
    bm = feature_ref.shape[0]
    rows = bm * K

    # Single leading-dim reshape to the 2-D (rows, C) compute shape; all
    # elementwise / EUP work is done in f32 regardless of the HBM dtype.
    f2 = feature_ref[...].reshape(rows, C).astype(jnp.float32)
    p2 = patches_ref[...].reshape(rows, _P_PAD).astype(jnp.float32)

    def lin(x, w_ref, b_ref):
        return (jnp.dot(x, w_ref[...].astype(jnp.float32),
                        preferred_element_type=jnp.float32)
                + b_ref[...].astype(jnp.float32))

    # Fused key/value projection: one (rows, C) @ (C, 2C) matmul.
    kv = lin(f2, wkv_ref, bkv_ref)            # (rows, 2C)
    key = kv[:, :C]
    value = kv[:, C:]

    # relation_qk = key - key[:, 0:1, :]  (only 3-D detour in the kernel)
    key3 = key.reshape(bm, K, C)
    rel = (key3 - key3[:, 0:1, :]).reshape(rows, C)

    # Fused positional encoding: multiplier | bias share one MLP evaluation.
    # Second layer is block-diagonal so pem / peb stay independent.
    pe_h = jnp.maximum(lin(p2, wpe1_ref, bpe1_ref), 0.0)   # (rows, 2C)
    pe = lin(pe_h, wpe2_ref, bpe2_ref)                     # (rows, 2C)
    pem = pe[:, :C]
    peb = pe[:, C:]

    rel = rel * pem + peb
    value = value + peb

    # weight_encoding: Linear -> ReLU -> Linear
    w = lin(jnp.maximum(lin(rel, wwe1_ref, bwe1_ref), 0.0), wwe2_ref, bwe2_ref)

    # softmax over channels; divide moved to the EUP with approx reciprocal.
    w_max = jnp.max(w, axis=-1, keepdims=True)
    e = jnp.exp(w - w_max)
    score = e * pl.reciprocal(jnp.sum(e, axis=-1, keepdims=True), approx=True)

    # score * value, then residual_emb: ReLU -> Linear(C, C)
    feat = score * value
    out = lin(jnp.maximum(feat, 0.0), wr_ref, br_ref)
    out_ref[...] = out.reshape(bm, K, C).astype(out_ref.dtype)


def _pick_block_m(M, K, target_rows=2048):
    """Largest block_m dividing M (multiple of 8, or == M) with block_m*K <= target."""
    cands = [d for d in range(1, M + 1) if M % d == 0 and (d % 8 == 0 or d == M)]
    fitting = [d for d in cands if d * K <= target_rows]
    return max(fitting) if fitting else min(cands)


def _fuse_params(params, C, dtype):
    (wk, bk, wv, bv, wpm1, bpm1, wpm2, bpm2,
     wpb1, bpb1, wpb2, bpb2, wwe1, bwe1, wwe2, bwe2, wr, br) = params
    w_kv = jnp.concatenate([wk, wv], axis=1)                    # (C, 2C)
    b_kv = jnp.concatenate([bk, bv], axis=1)                    # (1, 2C)
    w_pe1 = jnp.concatenate([wpm1, wpb1], axis=1)               # (3, 2C)
    w_pe1 = jnp.pad(w_pe1, ((0, _P_PAD - w_pe1.shape[0]), (0, 0)))   # (8, 2C)
    b_pe1 = jnp.concatenate([bpm1, bpb1], axis=1)               # (1, 2C)
    z = jnp.zeros((C, C), wpm2.dtype)
    w_pe2 = jnp.concatenate(
        [jnp.concatenate([wpm2, z], axis=1),
         jnp.concatenate([z, wpb2], axis=1)], axis=0)           # (2C, 2C) block-diag
    b_pe2 = jnp.concatenate([bpm2, bpb2], axis=1)               # (1, 2C)
    fused = (w_kv, b_kv, w_pe1, b_pe1, w_pe2, b_pe2,
             wwe1, bwe1, wwe2, bwe2, wr, br)
    return tuple(p.astype(dtype) for p in fused)


def self_attention(patches, feature, params, *, block_m=None, target_rows=2048):
    M, K, C = feature.shape
    dtype = feature.dtype

    if block_m is None:
        block_m = _pick_block_m(M, K, target_rows)
    assert M % block_m == 0

    # Pad xyz -> 8 channels (zeros) so the PE contraction dim is aligned.
    p_pad = jnp.pad(patches, ((0, 0), (0, 0), (0, _P_PAD - patches.shape[-1])))
    p_pad = p_pad.astype(dtype)
    fused = _fuse_params(params, C, dtype)

    in_specs = [
        pl.BlockSpec((block_m, K, _P_PAD), lambda i: (i, 0, 0)),
        pl.BlockSpec((block_m, K, C), lambda i: (i, 0, 0)),
    ] + [pl.BlockSpec(p.shape, lambda i: (0, 0)) for p in fused]

    # Explicit VMEM budget: 2x double-buffered tiles + params + headroom for
    # spilled f32 intermediates; capped so the same tiling is v7x-safe (64 MiB
    # physical / 32 MiB scoped default there).
    itemsize = jnp.dtype(dtype).itemsize
    tile_bytes = block_m * K * (C + _P_PAD + C) * itemsize       # in + out tiles
    param_bytes = sum(int(p.size) * p.dtype.itemsize for p in fused)
    interm_bytes = 24 * block_m * K * C * 4                      # live f32 temps
    vmem_limit = int(min(48 << 20,
                         max(16 << 20,
                             2 * (tile_bytes + param_bytes) + interm_bytes)))

    out = pl.pallas_call(
        functools.partial(_self_attention_kernel, K=K, C=C),
        out_shape=jax.ShapeDtypeStruct((M, K, C), dtype),
        grid_spec=pltpu.PrefetchScalarGridSpec(
            num_scalar_prefetch=0,
            grid=(M // block_m,),
            in_specs=in_specs,
            out_specs=pl.BlockSpec((block_m, K, C), lambda i: (i, 0, 0)),
        ),
        compiler_params=pltpu.CompilerParams(
            dimension_semantics=("parallel",),
            vmem_limit_bytes=vmem_limit),
    )(p_pad, feature, *fused)
    return out


# -------------------- parameter init (deterministic, torch-like) --------------------
def _init_linear(key, fan_in, fan_out):
    kw, kb = jax.random.split(key)
    bound = 1.0 / jnp.sqrt(fan_in)
    w = jax.random.uniform(kw, (fan_in, fan_out), jnp.float32, -bound, bound)
    b = jax.random.uniform(kb, (1, fan_out), jnp.float32, -bound, bound)
    return w, b


def make_params(key, channel):
    keys = jax.random.split(key, 9)
    wk, bk = _init_linear(keys[0], channel, channel)        # k_mlp
    wv, bv = _init_linear(keys[1], channel, channel)        # v_mlp
    wpm1, bpm1 = _init_linear(keys[2], 3, channel)          # linear_p_multiplier[0]
    wpm2, bpm2 = _init_linear(keys[3], channel, channel)    # linear_p_multiplier[2]
    wpb1, bpb1 = _init_linear(keys[4], 3, channel)          # linear_p_bias[0]
    wpb2, bpb2 = _init_linear(keys[5], channel, channel)    # linear_p_bias[2]
    wwe1, bwe1 = _init_linear(keys[6], channel, channel)    # weight_encoding[0]
    wwe2, bwe2 = _init_linear(keys[7], channel, channel)    # weight_encoding[2]
    wr, br = _init_linear(keys[8], channel, channel)        # residual_emb[1]
    return (wk, bk, wv, bv, wpm1, bpm1, wpm2, bpm2,
            wpb1, bpb1, wpb2, bpb2, wwe1, bwe1, wwe2, bwe2, wr, br)


# -------------------- pure-JAX reference for validation --------------------
def reference(patches, feature, params):
    (wk, bk, wv, bv, wpm1, bpm1, wpm2, bpm2,
     wpb1, bpb1, wpb2, bpb2, wwe1, bwe1, wwe2, bwe2, wr, br) = params
    key = feature @ wk + bk
    value = feature @ wv + bv
    relation_qk = key - key[:, 0:1, :]
    pem = jnp.maximum(patches @ wpm1 + bpm1, 0.0) @ wpm2 + bpm2
    relation_qk = relation_qk * pem
    peb = jnp.maximum(patches @ wpb1 + bpb1, 0.0) @ wpb2 + bpb2
    relation_qk = relation_qk + peb
    value = value + peb
    weight = jnp.maximum(relation_qk @ wwe1 + bwe1, 0.0) @ wwe2 + bwe2
    score = jax.nn.softmax(weight, axis=-1)
    feat = score * value
    return jnp.maximum(feat, 0.0) @ wr + br


if __name__ == "__main__":
    M, K, C = 8, 16, 32  # 8 patches, 16 points each, 32 channels
    root = jax.random.PRNGKey(0)
    k_p, k_f, k_w = jax.random.split(root, 3)
    patches = jax.random.normal(k_p, (M, K, 3), jnp.float32)
    feature = jax.random.normal(k_f, (M, K, C), jnp.float32)
    params = make_params(k_w, C)

    # --- f32 path ---
    out = jax.block_until_ready(self_attention(patches, feature, params))
    ref = reference(patches, feature, params)
    assert out.shape == (M, K, C)
    assert jnp.allclose(out, ref, atol=1e-2, rtol=1e-2), "f32 mismatch vs reference"

    # --- bf16-at-HBM path (compute stays f32 inside the kernel) ---
    p_bf = patches.astype(jnp.bfloat16)
    f_bf = feature.astype(jnp.bfloat16)
    out_bf = jax.block_until_ready(self_attention(p_bf, f_bf, params))
    params_rt = tuple(p.astype(jnp.bfloat16).astype(jnp.float32) for p in params)
    ref_bf = reference(p_bf.astype(jnp.float32), f_bf.astype(jnp.float32), params_rt)
    assert out_bf.shape == (M, K, C)
    assert jnp.allclose(out_bf.astype(jnp.float32), ref_bf, atol=3e-2, rtol=3e-2), \
        "bf16 mismatch vs reference"

    print("KERNEL_OK")
</pallas_src>

<mosaic_0001>
module attributes {stable_mosaic.version = 11 : i64} {
  func.func @_self_attention_kernel(%arg0: i32, %arg1: memref<8x16x8xf32, #tpu.memory_space<vmem>>, %arg2: memref<8x16x32xf32, #tpu.memory_space<vmem>>, %arg3: memref<32x64xf32, #tpu.memory_space<vmem>>, %arg4: memref<1x64xf32, #tpu.memory_space<vmem>>, %arg5: memref<8x64xf32, #tpu.memory_space<vmem>>, %arg6: memref<1x64xf32, #tpu.memory_space<vmem>>, %arg7: memref<64x64xf32, #tpu.memory_space<vmem>>, %arg8: memref<1x64xf32, #tpu.memory_space<vmem>>, %arg9: memref<32x32xf32, #tpu.memory_space<vmem>>, %arg10: memref<1x32xf32, #tpu.memory_space<vmem>>, %arg11: memref<32x32xf32, #tpu.memory_space<vmem>>, %arg12: memref<1x32xf32, #tpu.memory_space<vmem>>, %arg13: memref<32x32xf32, #tpu.memory_space<vmem>>, %arg14: memref<1x32xf32, #tpu.memory_space<vmem>>, %arg15: memref<8x16x32xf32, #tpu.memory_space<vmem>>) attributes {dimension_semantics = [#tpu.dimension_semantics<parallel>], iteration_bounds = array<i64: 1>, scalar_prefetch = 0 : i64, scratch_operands = 0 : i64, tpu.core_type = #tpu.core_type<tc>, window_params = [{transform_indices = @transform_0, window_bounds = array<i64: 8, 16, 8>}, {transform_indices = @transform_1, window_bounds = array<i64: 8, 16, 32>}, {pipeline_mode = #tpu.pipeline_mode<synchronous>, transform_indices = @transform_2, window_bounds = array<i64: 32, 64>}, {pipeline_mode = #tpu.pipeline_mode<synchronous>, transform_indices = @transform_3, window_bounds = array<i64: 1, 64>}, {pipeline_mode = #tpu.pipeline_mode<synchronous>, transform_indices = @transform_4, window_bounds = array<i64: 8, 64>}, {pipeline_mode = #tpu.pipeline_mode<synchronous>, transform_indices = @transform_5, window_bounds = array<i64: 1, 64>}, {pipeline_mode = #tpu.pipeline_mode<synchronous>, transform_indices = @transform_6, window_bounds = array<i64: 64, 64>}, {pipeline_mode = #tpu.pipeline_mode<synchronous>, transform_indices = @transform_7, window_bounds = array<i64: 1, 64>}, {pipeline_mode = #tpu.pipeline_mode<synchronous>, transform_indices = @transform_8, window_bounds = array<i64: 32, 32>}, {pipeline_mode = #tpu.pipeline_mode<synchronous>, transform_indices = @transform_9, window_bounds = array<i64: 1, 32>}, {pipeline_mode = #tpu.pipeline_mode<synchronous>, transform_indices = @transform_10, window_bounds = array<i64: 32, 32>}, {pipeline_mode = #tpu.pipeline_mode<synchronous>, transform_indices = @transform_11, window_bounds = array<i64: 1, 32>}, {pipeline_mode = #tpu.pipeline_mode<synchronous>, transform_indices = @transform_12, window_bounds = array<i64: 32, 32>}, {pipeline_mode = #tpu.pipeline_mode<synchronous>, transform_indices = @transform_13, window_bounds = array<i64: 1, 32>}, {transform_indices = @transform_14, window_bounds = array<i64: 8, 16, 32>}]} {
    %c0 = arith.constant 0 : index
    %c0_0 = arith.constant 0 : index
    %c0_1 = arith.constant 0 : index
    %0 = vector.load %arg2[%c0, %c0_0, %c0_1] : memref<8x16x32xf32, #tpu.memory_space<vmem>>, vector<8x16x32xf32>
    %1 = vector.shape_cast %0 : vector<8x16x32xf32> to vector<128x32xf32>
    %c0_2 = arith.constant 0 : index
    %c0_3 = arith.constant 0 : index
    %c0_4 = arith.constant 0 : index
    %2 = vector.load %arg1[%c0_2, %c0_3, %c0_4] : memref<8x16x8xf32, #tpu.memory_space<vmem>>, vector<8x16x8xf32>
    %3 = vector.shape_cast %2 : vector<8x16x8xf32> to vector<128x8xf32>
    %c0_5 = arith.constant 0 : index
    %c0_6 = arith.constant 0 : index
    %4 = vector.load %arg3[%c0_5, %c0_6] : memref<32x64xf32, #tpu.memory_space<vmem>>, vector<32x64xf32>
    %cst = arith.constant dense<0.000000e+00> : vector<128x64xf32>
    %5 = tpu.matmul %1, %4, %cst {dimension_numbers = #tpu.dot_dimension_numbers<[1], [0], [0], [1], [0, 0, 1, 1], [], []>} : vector<128x32xf32>, vector<32x64xf32>, vector<128x64xf32> -> vector<128x64xf32>
    %c0_7 = arith.constant 0 : index
    %c0_8 = arith.constant 0 : index
    %6 = vector.load %arg4[%c0_7, %c0_8] : memref<1x64xf32, #tpu.memory_space<vmem>>, vector<1x64xf32>
    %7 = vector.broadcast %6 : vector<1x64xf32> to vector<128x64xf32>
    %8 = arith.addf %5, %7 : vector<128x64xf32>
    %9 = vector.extract_strided_slice %8 {offsets = [0, 0], sizes = [128, 32], strides = [1, 1]} : vector<128x64xf32> to vector<128x32xf32>
    %10 = vector.extract_strided_slice %8 {offsets = [0, 32], sizes = [128, 32], strides = [1, 1]} : vector<128x64xf32> to vector<128x32xf32>
    %11 = vector.shape_cast %9 : vector<128x32xf32> to vector<8x16x32xf32>
    %12 = vector.extract_strided_slice %11 {offsets = [0, 0, 0], sizes = [8, 1, 32], strides = [1, 1, 1]} : vector<8x16x32xf32> to vector<8x1x32xf32>
    %13 = vector.broadcast %12 : vector<8x1x32xf32> to vector<8x16x32xf32>
    %14 = arith.subf %11, %13 : vector<8x16x32xf32>
    %15 = vector.shape_cast %14 : vector<8x16x32xf32> to vector<128x32xf32>
    %c0_9 = arith.constant 0 : index
    %c0_10 = arith.constant 0 : index
    %16 = vector.load %arg5[%c0_9, %c0_10] : memref<8x64xf32, #tpu.memory_space<vmem>>, vector<8x64xf32>
    %cst_11 = arith.constant dense<0.000000e+00> : vector<128x64xf32>
    %17 = tpu.matmul %3, %16, %cst_11 {dimension_numbers = #tpu.dot_dimension_numbers<[1], [0], [0], [1], [0, 0, 1, 1], [], []>} : vector<128x8xf32>, vector<8x64xf32>, vector<128x64xf32> -> vector<128x64xf32>
    %c0_12 = arith.constant 0 : index
    %c0_13 = arith.constant 0 : index
    %18 = vector.load %arg6[%c0_12, %c0_13] : memref<1x64xf32, #tpu.memory_space<vmem>>, vector<1x64xf32>
    %19 = vector.broadcast %18 : vector<1x64xf32> to vector<128x64xf32>
    %20 = arith.addf %17, %19 : vector<128x64xf32>
    %cst_14 = arith.constant 0.000000e+00 : f32
    %21 = vector.broadcast %cst_14 : f32 to vector<128x64xf32>
    %22 = arith.maximumf %20, %21 : vector<128x64xf32>
    %c0_15 = arith.constant 0 : index
    %c0_16 = arith.constant 0 : index
    %23 = vector.load %arg7[%c0_15, %c0_16] : memref<64x64xf32, #tpu.memory_space<vmem>>, vector<64x64xf32>
    %cst_17 = arith.constant dense<0.000000e+00> : vector<128x64xf32>
    %24 = tpu.matmul %22, %23, %cst_17 {dimension_numbers = #tpu.dot_dimension_numbers<[1], [0], [0], [1], [0, 0, 1, 1], [], []>} : vector<128x64xf32>, vector<64x64xf32>, vector<128x64xf32> -> vector<128x64xf32>
    %c0_18 = arith.constant 0 : index
    %c0_19 = arith.constant 0 : index
    %25 = vector.load %arg8[%c0_18, %c0_19] : memref<1x64xf32, #tpu.memory_space<vmem>>, vector<1x64xf32>
    %26 = vector.broadcast %25 : vector<1x64xf32> to vector<128x64xf32>
    %27 = arith.addf %24, %26 : vector<128x64xf32>
    %28 = vector.extract_strided_slice %27 {offsets = [0, 0], sizes = [128, 32], strides = [1, 1]} : vector<128x64xf32> to vector<128x32xf32>
    %29 = vector.extract_strided_slice %27 {offsets = [0, 32], sizes = [128, 32], strides = [1, 1]} : vector<128x64xf32> to vector<128x32xf32>
    %30 = arith.mulf %15, %28 : vector<128x32xf32>
    %31 = arith.addf %30, %29 : vector<128x32xf32>
    %32 = arith.addf %10, %29 : vector<128x32xf32>
    %c0_20 = arith.constant 0 : index
    %c0_21 = arith.constant 0 : index
    %33 = vector.load %arg9[%c0_20, %c0_21] : memref<32x32xf32, #tpu.memory_space<vmem>>, vector<32x32xf32>
    %cst_22 = arith.constant dense<0.000000e+00> : vector<128x32xf32>
    %34 = tpu.matmul %31, %33, %cst_22 {dimension_numbers = #tpu.dot_dimension_numbers<[1], [0], [0], [1], [0, 0, 1, 1], [], []>} : vector<128x32xf32>, vector<32x32xf32>, vector<128x32xf32> -> vector<128x32xf32>
    %c0_23 = arith.constant 0 : index
    %c0_24 = arith.constant 0 : index
    %35 = vector.load %arg10[%c0_23, %c0_24] : memref<1x32xf32, #tpu.memory_space<vmem>>, vector<1x32xf32>
    %36 = vector.broadcast %35 : vector<1x32xf32> to vector<128x32xf32>
    %37 = arith.addf %34, %36 : vector<128x32xf32>
    %cst_25 = arith.constant 0.000000e+00 : f32
    %38 = vector.broadcast %cst_25 : f32 to vector<128x32xf32>
    %39 = arith.maximumf %37, %38 : vector<128x32xf32>
    %c0_26 = arith.constant 0 : index
    %c0_27 = arith.constant 0 : index
    %40 = vector.load %arg11[%c0_26, %c0_27] : memref<32x32xf32, #tpu.memory_space<vmem>>, vector<32x32xf32>
    %cst_28 = arith.constant dense<0.000000e+00> : vector<128x32xf32>
    %41 = tpu.matmul %39, %40, %cst_28 {dimension_numbers = #tpu.dot_dimension_numbers<[1], [0], [0], [1], [0, 0, 1, 1], [], []>} : vector<128x32xf32>, vector<32x32xf32>, vector<128x32xf32> -> vector<128x32xf32>
    %c0_29 = arith.constant 0 : index
    %c0_30 = arith.constant 0 : index
    %42 = vector.load %arg12[%c0_29, %c0_30] : memref<1x32xf32, #tpu.memory_space<vmem>>, vector<1x32xf32>
    %43 = vector.broadcast %42 : vector<1x32xf32> to vector<128x32xf32>
    %44 = arith.addf %41, %43 : vector<128x32xf32>
    %cst_31 = arith.constant dense<0xFF800000> : vector<128xf32>
    %45 = vector.multi_reduction <maximumf>, %44, %cst_31 [1] : vector<128x32xf32> to vector<128xf32>
    %46 = vector.shape_cast %45 : vector<128xf32> to vector<128x1xf32>
    %47 = vector.broadcast %46 : vector<128x1xf32> to vector<128x32xf32>
    %48 = arith.subf %44, %47 : vector<128x32xf32>
    %49 = math.exp %48 : vector<128x32xf32>
    %cst_32 = arith.constant dense<0.000000e+00> : vector<128xf32>
    %50 = vector.multi_reduction <add>, %49, %cst_32 [1] : vector<128x32xf32> to vector<128xf32>
    %51 = vector.shape_cast %50 : vector<128xf32> to vector<128x1xf32>
    %52 = tpu.reciprocal %51 {approx = true} : vector<128x1xf32> -> vector<128x1xf32>
    %53 = vector.broadcast %52 : vector<128x1xf32> to vector<128x32xf32>
    %54 = arith.mulf %49, %53 : vector<128x32xf32>
    %55 = arith.mulf %54, %32 : vector<128x32xf32>
    %cst_33 = arith.constant 0.000000e+00 : f32
    %56 = vector.broadcast %cst_33 : f32 to vector<128x32xf32>
    %57 = arith.maximumf %55, %56 : vector<128x32xf32>
    %c0_34 = arith.constant 0 : index
    %c0_35 = arith.constant 0 : index
    %58 = vector.load %arg13[%c0_34, %c0_35] : memref<32x32xf32, #tpu.memory_space<vmem>>, vector<32x32xf32>
    %cst_36 = arith.constant dense<0.000000e+00> : vector<128x32xf32>
    %59 = tpu.matmul %57, %58, %cst_36 {dimension_numbers = #tpu.dot_dimension_numbers<[1], [0], [0], [1], [0, 0, 1, 1], [], []>} : vector<128x32xf32>, vector<32x32xf32>, vector<128x32xf32> -> vector<128x32xf32>
    %c0_37 = arith.constant 0 : index
    %c0_38 = arith.constant 0 : index
    %60 = vector.load %arg14[%c0_37, %c0_38] : memref<1x32xf32, #tpu.memory_space<vmem>>, vector<1x32xf32>
    %61 = vector.broadcast %60 : vector<1x32xf32> to vector<128x32xf32>
    %62 = arith.addf %59, %61 : vector<128x32xf32>
    %63 = vector.shape_cast %62 : vector<128x32xf32> to vector<8x16x32xf32>
    %c0_39 = arith.constant 0 : index
    %c0_40 = arith.constant 0 : index
    %c0_41 = arith.constant 0 : index
    %64 = vector.load %arg15[%c0_39, %c0_40, %c0_41] : memref<8x16x32xf32, #tpu.memory_space<vmem>>, vector<8x16x32xf32>
    tpu.vector_store %arg15[%c0_39, %c0_40, %c0_41], %63 {strides = array<i32>} : memref<8x16x32xf32, #tpu.memory_space<vmem>>, vector<8x16x32xf32>,
    return
  }
  func.func @transform_0(%arg0: i32) -> (i32, i32, i32) {
    %c0_i32 = arith.constant 0 : i32
    %c0_i32_0 = arith.constant 0 : i32
    %c0_i32_1 = arith.constant 0 : i32
    return %arg0, %c0_i32, %c0_i32_0 : i32, i32, i32
  }
  func.func @transform_1(%arg0: i32) -> (i32, i32, i32) {
    %c0_i32 = arith.constant 0 : i32
    %c0_i32_0 = arith.constant 0 : i32
    %c0_i32_1 = arith.constant 0 : i32
    return %arg0, %c0_i32, %c0_i32_0 : i32, i32, i32
  }
  func.func @transform_2(%arg0: i32) -> (i32, i32) {
    %c0_i32 = arith.constant 0 : i32
    %c0_i32_0 = arith.constant 0 : i32
    %c0_i32_1 = arith.constant 0 : i32
    return %c0_i32, %c0_i32_0 : i32, i32
  }
  func.func @transform_3(%arg0: i32) -> (i32, i32) {
    %c0_i32 = arith.constant 0 : i32
    %c0_i32_0 = arith.constant 0 : i32
    %c0_i32_1 = arith.constant 0 : i32
    return %c0_i32, %c0_i32_0 : i32, i32
  }
  func.func @transform_4(%arg0: i32) -> (i32, i32) {
    %c0_i32 = arith.constant 0 : i32
    %c0_i32_0 = arith.constant 0 : i32
    %c0_i32_1 = arith.constant 0 : i32
    return %c0_i32, %c0_i32_0 : i32, i32
  }
  func.func @transform_5(%arg0: i32) -> (i32, i32) {
    %c0_i32 = arith.constant 0 : i32
    %c0_i32_0 = arith.constant 0 : i32
    %c0_i32_1 = arith.constant 0 : i32
    return %c0_i32, %c0_i32_0 : i32, i32
  }
  func.func @transform_6(%arg0: i32) -> (i32, i32) {
    %c0_i32 = arith.constant 0 : i32
    %c0_i32_0 = arith.constant 0 : i32
    %c0_i32_1 = arith.constant 0 : i32
    return %c0_i32, %c0_i32_0 : i32, i32
  }
  func.func @transform_7(%arg0: i32) -> (i32, i32) {
    %c0_i32 = arith.constant 0 : i32
    %c0_i32_0 = arith.constant 0 : i32
    %c0_i32_1 = arith.constant 0 : i32
    return %c0_i32, %c0_i32_0 : i32, i32
  }
  func.func @transform_8(%arg0: i32) -> (i32, i32) {
    %c0_i32 = arith.constant 0 : i32
    %c0_i32_0 = arith.constant 0 : i32
    %c0_i32_1 = arith.constant 0 : i32
    return %c0_i32, %c0_i32_0 : i32, i32
  }
  func.func @transform_9(%arg0: i32) -> (i32, i32) {
    %c0_i32 = arith.constant 0 : i32
    %c0_i32_0 = arith.constant 0 : i32
    %c0_i32_1 = arith.constant 0 : i32
    return %c0_i32, %c0_i32_0 : i32, i32
  }
  func.func @transform_10(%arg0: i32) -> (i32, i32) {
    %c0_i32 = arith.constant 0 : i32
    %c0_i32_0 = arith.constant 0 : i32
    %c0_i32_1 = arith.constant 0 : i32
    return %c0_i32, %c0_i32_0 : i32, i32
  }
  func.func @transform_11(%arg0: i32) -> (i32, i32) {
    %c0_i32 = arith.constant 0 : i32
    %c0_i32_0 = arith.constant 0 : i32
    %c0_i32_1 = arith.constant 0 : i32
    return %c0_i32, %c0_i32_0 : i32, i32
  }
  func.func @transform_12(%arg0: i32) -> (i32, i32) {
    %c0_i32 = arith.constant 0 : i32
    %c0_i32_0 = arith.constant 0 : i32
    %c0_i32_1 = arith.constant 0 : i32
    return %c0_i32, %c0_i32_0 : i32, i32
  }
  func.func @transform_13(%arg0: i32) -> (i32, i32) {
    %c0_i32 = arith.constant 0 : i32
    %c0_i32_0 = arith.constant 0 : i32
    %c0_i32_1 = arith.constant 0 : i32
    return %c0_i32, %c0_i32_0 : i32, i32
  }
  func.func @transform_14(%arg0: i32) -> (i32, i32, i32) {
    %c0_i32 = arith.constant 0 : i32
    %c0_i32_0 = arith.constant 0 : i32
    %c0_i32_1 = arith.constant 0 : i32
    return %arg0, %c0_i32, %c0_i32_0 : i32, i32, i32
  }
}

</mosaic_0001>

<bundles_post_ra>
// kernel: tpu_custom_call.1
= control target key start
LH: loop header
LB: loop body
LE: loop exit
PB: predicated region body
PF: predicated region fallthrough
CT: control target
= control target key end

     0   :  { %19 = vsyncpa [#allocation3], 0  ;;  %s3448_s0 = inlined_call_operand.vmem [shape: f32[8,16,8], index: 0, kind: input, shape index: {}]   ;;  %s3449_s1 = inlined_call_operand.vmem [shape: f32[8,16,32], index: 1, kind: input, shape index: {}]   ;;  %s3450_s2 = inlined_call_operand.hbm [shape: f32[32,64], index: 2, kind: input, shape index: {}]   ;;  %s3451_s3 = inlined_call_operand.vmem [shape: f32[1,64], index: 3, kind: input, shape index: {}]   ;;  %s3452_s4 = inlined_call_operand.hbm [shape: f32[8,64], index: 4, kind: input, shape index: {}]   ;;  %s3453_s5 = inlined_call_operand.vmem [shape: f32[1,64], index: 5, kind: input, shape index: {}]   ;;  %s3454_s6 = inlined_call_operand.vmem [shape: f32[64,64], index: 6, kind: input, shape index: {}]   ;;  %s3455_s7 = inlined_call_operand.hbm [shape: f32[1,64], index: 7, kind: input, shape index: {}]   ;;  %s3456_s8 = inlined_call_operand.hbm [shape: f32[32,32], index: 8, kind: input, shape index: {}]   ;;  %s3457_s9 = inlined_call_operand.hbm [shape: f32[1,32], index: 9, kind: input, shape index: {}]   ;;  %s3458_s10 = inlined_call_operand.vmem [shape: f32[32,32], index: 10, kind: input, shape index: {}]   ;;  %s3459_s11 = inlined_call_operand.vmem [shape: f32[1,32], index: 11, kind: input, shape index: {}]   ;;  %s3460_s12 = inlined_call_operand.hbm [shape: f32[32,32], index: 12, kind: input, shape index: {}]   ;;  %s3461_s13 = inlined_call_operand.vmem [shape: f32[1,32], index: 13, kind: input, shape index: {}]   ;;  %s3462_s14 = inlined_call_operand.hbm [shape: f32[8,16,32], index: 14, kind: output, shape index: {}]  }
   0x1   :  { %20 = vsyncpa [#allocation6], 0 }
   0x2   :  { %21 = vsyncpa [#allocation9], 0 }
   0x3   :  { %22 = vsyncpa [#allocation12], 0 }
   0x4   :  { %23 = vsyncpa [#allocation4], 0  ;;  %s2587_s29 = smov [#allocation5]   ;;  %s2423_s17 = scalar_lea.hbm %s3452_s4, 128 }
   0x5   :  { %s48_s30 = sshll.u32 %s2587_s29, 4  ;;  %p2424_p0 = scmp.ne.s32.totalorder %s3452_s4, %s2423_s17  ;;  %s49_s30 = int_to_ptr.vmem [resolvable:$true] %s48_s30 }
   0x6   :  { %p2427_p1 = scmp.lt.u32.totalorder %s2423_s17, %s3452_s4 }
   0x8   :  { %p2429_p2 = pnand %p2427_p1, %p2424_p0 }
   0xa   :  { %2432 = shalt.err (!%p2429_p2)
}
   0xb   :  { %s2433_s22 = scalar_lea.vmem %s49_s30, 128  ;;  %p2438_p4 = scmp.lt.s32.totalorder %s49_s30, %s49_s30 }
   0xc   :  { %p2434_p3 = scmp.ne.s32.totalorder %s49_s30, %s2433_s22  ;;  %p2439_p5 = scmp.lt.s32.totalorder %s2433_s22, %s2433_s22 }
   0xe   :  { %p2440_p6 = por %p2439_p5, %p2438_p4 }
  0x10   :  { %p2441_p7 = pnand %p2440_p6, %p2434_p3 }
  0x12   :  { %2444 = shalt.err (!%p2441_p7)
}
  0x13   :  { %51 = dma.hbm_to_vmem [thread:$0]  %s3452_s4, 128, %s49_s30, [#allocation6]  }
  0x14   :  { %s2588_s25 = smov [#allocation8]   ;;  %s2589_s27 = smov [#allocation2]  }
  0x15   :  { %s71_s26 = sshll.u32 %s2588_s25, 4  ;;  %s33_s28 = sshll.u32 %s2589_s27, 4  ;;  %s72_s26 = int_to_ptr.vmem [resolvable:$true] %s71_s26  ;;  %s34_s28 = int_to_ptr.vmem [resolvable:$true] %s33_s28 }
  0x16   :  { %s2445_s16 = scalar_lea.hbm %s3456_s8, 512 }
  0x17   :  { %p2446_p8 = scmp.ne.s32.totalorder %s3456_s8, %s2445_s16  ;;  %p2449_p9 = scmp.lt.u32.totalorder %s2445_s16, %s3456_s8 }
  0x19   :  { %p2451_p10 = pnand %p2449_p9, %p2446_p8 }
  0x1b   :  { %2454 = shalt.err (!%p2451_p10)
}
  0x1c   :  { %s2455_s4 = scalar_lea.vmem %s72_s26, 512  ;;  %p2460_p12 = scmp.lt.s32.totalorder %s72_s26, %s72_s26 }
  0x1d   :  { %p2456_p11 = scmp.ne.s32.totalorder %s72_s26, %s2455_s4  ;;  %p2461_p13 = scmp.lt.s32.totalorder %s2455_s4, %s2455_s4 }
  0x1f   :  { %p2462_p0 = por %p2461_p13, %p2460_p12 }
  0x21   :  { %p2463_p1 = pnand %p2462_p0, %p2456_p11 }
  0x23   :  { %2466 = shalt.err (!%p2463_p1)
}
  0x24   :  { %s2590_s30 = smov 128   ;;  %s2591_s21 = smov 8  }
  0x25   :  { %77 = dma.hbm_to_vmem [thread:$0]  %s3456_s8, 512, %s72_s26, [#allocation9], %s2590_s30, %s2590_s30, %s2591_s21  }
  0x26   :  { %s2467_s27 = scalar_lea.hbm %s3450_s2, 512 }
  0x27   :  { %p2468_p2 = scmp.ne.s32.totalorder %s3450_s2, %s2467_s27  ;;  %p2471_p3 = scmp.lt.u32.totalorder %s2467_s27, %s3450_s2 }
  0x29   :  { %p2473_p4 = pnand %p2471_p3, %p2468_p2 }
  0x2b   :  { %2476 = shalt.err (!%p2473_p4)
}
  0x2c   :  { %s2477_s18 = scalar_lea.vmem %s34_s28, 512  ;;  %p2482_p6 = scmp.lt.s32.totalorder %s34_s28, %s34_s28 }
  0x2d   :  { %p2478_p5 = scmp.ne.s32.totalorder %s34_s28, %s2477_s18  ;;  %p2483_p7 = scmp.lt.s32.totalorder %s2477_s18, %s2477_s18 }
  0x2f   :  { %p2484_p8 = por %p2483_p7, %p2482_p6 }
  0x31   :  { %p2485_p9 = pnand %p2484_p8, %p2478_p5 }
  0x33   :  { %2488 = shalt.err (!%p2485_p9)
}
  0x34   :  { %39 = dma.hbm_to_vmem [thread:$0]  %s3450_s2, 512, %s34_s28, [#allocation3], %s2590_s30, %s2590_s30, %s2591_s21  }
  0x35   :  { %s2592_s19 = smov [#allocation7]   ;;  %s2593_s4 = smov [#allocation10]  }
  0x36   :  { %s62_s20 = sshll.u32 %s2592_s19, 4  ;;  %s84_s22 = sshll.u32 %s2593_s4, 4  ;;  %s63_s20 = int_to_ptr.vmem [resolvable:$true] %s62_s20  ;;  %s85_s22 = int_to_ptr.vmem [resolvable:$true] %s84_s22 }
  0x37   :  { %s2489_s25 = scalar_lea.hbm %s3455_s7, 16 }
  0x38   :  { %p2490_p10 = scmp.ne.s32.totalorder %s3455_s7, %s2489_s25  ;;  %p2493_p11 = scmp.lt.u32.totalorder %s2489_s25, %s3455_s7 }
  0x3a   :  { %p2495_p12 = pnand %p2493_p11, %p2490_p10 }
  0x3c   :  { %2498 = shalt.err (!%p2495_p12)
}
  0x3d   :  { %s2499_s2 = scalar_lea.vmem %s63_s20, 16  ;;  %s2503_s28 = scalar_lea.vmem %s63_s20, 32 }
  0x3e   :  { %p2500_p13 = scmp.ne.s32.totalorder %s63_s20, %s2499_s2  ;;  %p2504_p0 = scmp.lt.s32.totalorder %s63_s20, %s63_s20 }
  0x3f   :  { %p2505_p1 = scmp.lt.s32.totalorder %s2503_s28, %s2499_s2 }
  0x41   :  { %p2506_p2 = por %p2505_p1, %p2504_p0 }
  0x43   :  { %p2507_p3 = pnand %p2506_p2, %p2500_p13 }
  0x45   :  { %2510 = shalt.err (!%p2507_p3)
}
  0x46   :  { %65 = dma.hbm_to_vmem [thread:$0]  %s3455_s7, 16, %s63_s20, [#allocation6]  }
  0x47   :  { %s2511_s19 = scalar_lea.hbm %s3457_s9, 16 }
  0x48   :  { %p2512_p4 = scmp.ne.s32.totalorder %s3457_s9, %s2511_s19  ;;  %p2515_p5 = scmp.lt.u32.totalorder %s2511_s19, %s3457_s9 }
  0x4a   :  { %p2517_p6 = pnand %p2515_p5, %p2512_p4 }
  0x4c   :  { %2520 = shalt.err (!%p2517_p6)
}
  0x4d   :  { %s2521_s27 = scalar_lea.vmem %s85_s22, 16  ;;  %s2525_s29 = scalar_lea.vmem %s85_s22, 32 }
  0x4e   :  { %p2522_p7 = scmp.ne.s32.totalorder %s85_s22, %s2521_s27  ;;  %p2526_p8 = scmp.lt.s32.totalorder %s85_s22, %s85_s22 }
  0x4f   :  { %p2527_p9 = scmp.lt.s32.totalorder %s2525_s29, %s2521_s27 }
  0x51   :  { %p2528_p10 = por %p2527_p9, %p2526_p8 }
  0x53   :  { %p2529_p11 = pnand %p2528_p10, %p2522_p7 }
  0x55   :  { %2532 = shalt.err (!%p2529_p11)
}
  0x56   :  { %87 = dma.hbm_to_vmem [thread:$0]  %s3457_s9, 16, %s85_s22, [#allocation9]  }
  0x57   :  { %s2594_s15 = smov [#allocation11]   ;;  %s2533_s17 = scalar_lea.hbm %s3460_s12, 512 }
  0x58   :  { %s97_s16 = sshll.u32 %s2594_s15, 4  ;;  %p2534_p12 = scmp.ne.s32.totalorder %s3460_s12, %s2533_s17  ;;  %s98_s16 = int_to_ptr.vmem [resolvable:$true] %s97_s16 }
  0x59   :  { %p2537_p13 = scmp.lt.u32.totalorder %s2533_s17, %s3460_s12 }
  0x5b   :  { %p2539_p0 = pnand %p2537_p13, %p2534_p12 }
  0x5d   :  { %2542 = shalt.err (!%p2539_p0)
}
  0x5e   :  { %s2543_s4 = scalar_lea.vmem %s98_s16, 512  ;;  %p2548_p2 = scmp.lt.s32.totalorder %s98_s16, %s98_s16 }
  0x5f   :  { %p2544_p1 = scmp.ne.s32.totalorder %s98_s16, %s2543_s4  ;;  %p2549_p3 = scmp.lt.s32.totalorder %s2543_s4, %s2543_s4 }
  0x61   :  { %p2550_p4 = por %p2549_p3, %p2548_p2 }
  0x63   :  { %p2551_p5 = pnand %p2550_p4, %p2544_p1 }
  0x65   :  { %2554 = shalt.err (!%p2551_p5)
}
  0x66   :  { %103 = dma.hbm_to_vmem [thread:$0]  %s3460_s12, 512, %s98_s16, [#allocation12], %s2590_s30, %s2590_s30, %s2591_s21  }
  0x67   :  { %2577 = dma.done.wait [#allocation3], 512  }
  0x68   :  { %2578 = vsyncadd [#allocation3], 4294966784 }
  0x69   :  { %2579 = dma.done.wait [#allocation6], 144  }
  0x6a   :  { %2580 = vsyncadd [#allocation6], 4294967152 }
  0x6b   :  { %2581 = dma.done.wait [#allocation9], 528  }
  0x6c   :  { %2582 = vsyncadd [#allocation9], 4294966768 }
  0x6d   :  { %2583 = dma.done.wait [#allocation12], 512  }
  0x6e   :  { %2584 = vsyncadd [#allocation12], 4294966784  ;;  %vm417_vm0 = vcmask 64512   ;;  %v409_v0 = vld [vmem:[#allocation5] sm:$0xff]  ;;  %v141_v2 = vld [vmem:[%s3448_s0 + $0x8] sm:$0xff]  ;;  %vm167_vm1 = vcmask 261120  }
  0x6f   :  { %v140_v1 = vld [vmem:[%s3448_s0] sm:$0xff]  ;;  %2139 = vmatprep.subr.mxu1 %v409_v0  ;;  %v142_v3 = vld [vmem:[%s3448_s0 + $0x10] sm:$0xff]  ;;  %v143_v4 = vld [vmem:[%s3448_s0 + $0x18] sm:$0xff]  ;;  %vm642_vm2 = vcmask 523264  }
  0x70   :  { %2141 = vmatprep.mubr.msk.f32.mxu1 %vm417_vm0, %v140_v1  ;;  %2140 = vmatpush3.msra.mxu1 %v409_v0  ;;  %v144_v5 = vld [vmem:[%s3448_s0 + $0x20] sm:$0xff]  ;;  %v145_v7 = vld [vmem:[%s3448_s0 + $0x28] sm:$0xff]  ;;  %v629_v9 = vld [vmem:[%s3454_s6 + $0x10] sm:$0xff] }
  0x71   :  { %2142 = vmatmul.mubr.msk.f32.vlgmr.msra.gmra.mrb[0].mxu1 %vm417_vm0, %v141_v2  ;;  %v627_v6 = vld [vmem:[%s3454_s6] sm:$0xff]  ;;  %v628_v8 = vld [vmem:[%s3454_s6 + $0x8] sm:$0xff]  ;;  %v630_v10 = vld [vmem:[%s3454_s6 + $0x18] sm:$0xff] }
  0x72   :  { %2144 = vmatprep.mubr.msk.f32.mxu1 %vm417_vm0, %v142_v3  ;;  %v2309_v11 = vpack.c.bf16 %v628_v8, %v627_v6  ;;  %v2313_v12 = vpack.c.bf16 %v630_v10, %v629_v9  ;;  %v631_v13 = vld [vmem:[%s3454_s6 + $0x20] sm:$0xff]  ;;  %v632_v14 = vld [vmem:[%s3454_s6 + $0x28] sm:$0xff]  ;;  %v158_v17 = vld [vmem:[#allocation2 + $0x10] sm:$0xff] }
  0x73   :  { %v156_v15 = vld [vmem:[#allocation2] sm:$0xff]  ;;  %v157_v16 = vld [vmem:[#allocation2 + $0x8] sm:$0xff]  ;;  %v159_v18 = vld [vmem:[#allocation2 + $0x18] sm:$0xff]  ;;  %v2317_v22 = vpack.c.bf16 %v632_v14, %v631_v13 }
  0x74   :  { %v146_v19 = vld [vmem:[%s3448_s0 + $0x30] sm:$0xff]  ;;  %2310 = vmatprep.subr.bf16.mxu1 %v2309_v11  ;;  %v2301_v20 = vpack.c.bf16 %v157_v16, %v156_v15  ;;  %v2305_v21 = vpack.c.bf16 %v159_v18, %v158_v17  ;;  %v147_v23 = vld [vmem:[%s3448_s0 + $0x38] sm:$0xff]  ;;  %v148_v26 = vld [vmem:[%s3448_s0 + $0x40] sm:$0xff] }
  0x75   :  { %2145 = vmatmul.mubr.msk.f32.gmra.mrb[2].mxu1 %vm417_vm0, %v143_v4  ;;  %v633_v24 = vld [vmem:[%s3454_s6 + $0x30] sm:$0xff]  ;;  %v634_v25 = vld [vmem:[%s3454_s6 + $0x38] sm:$0xff]  ;;  %v149_v28 = vld [vmem:[%s3448_s0 + $0x48] sm:$0xff] }
  0x76   :  { %2147 = vmatprep.mubr.msk.f32.mxu1 %vm417_vm0, %v144_v5  ;;  %2312 = vmatpush3.bf16.msra.mxu1 %v2309_v11  ;;  %v2321_v27 = vpack.c.bf16 %v634_v25, %v633_v24  ;;  %v150_v29 = vld [vmem:[%s3448_s0 + $0x50] sm:$0xff]  ;;  %v151_v30 = vld [vmem:[%s3448_s0 + $0x58] sm:$0xff]  ;;  %v152_v31 = vld [vmem:[%s3448_s0 + $0x60] sm:$0xff] }
  0x77   :  { %2314 = vmatprep.subr.bf16.mxu1 %v2313_v12  ;;  %2302 = vmatprep.subr.bf16.mxu0 %v2301_v20  ;;  %v153_v32 = vld [vmem:[%s3448_s0 + $0x68] sm:$0xff]  ;;  %v154_v33 = vld [vmem:[%s3448_s0 + $0x70] sm:$0xff]  ;;  %v155_v34 = vld [vmem:[%s3448_s0 + $0x78] sm:$0xff] }
  0x78   :  { %2304 = vmatpush3.bf16.msra.mxu0 %v2301_v20  ;;  %v124_v35 = vld [vmem:[%s3449_s1] sm:$0xff]  ;;  %v125_v36 = vld [vmem:[%s3449_s1 + $0x8] sm:$0xff]  ;;  %v126_v37 = vld [vmem:[%s3449_s1 + $0x10] sm:$0xff] }
  0x79   :  { %2148 = vmatmul.mubr.msk.f32.gmra.mrb[4].mxu1 %vm417_vm0, %v145_v7  ;;  %2306 = vmatprep.subr.bf16.mxu0 %v2305_v21  ;;  %v127_v38 = vld [vmem:[%s3449_s1 + $0x18] sm:$0xff]  ;;  %v128_v39 = vld [vmem:[%s3449_s1 + $0x20] sm:$0xff]  ;;  %v129_v40 = vld [vmem:[%s3449_s1 + $0x28] sm:$0xff] }
  0x7a   :  { %2150 = vmatprep.mubr.msk.f32.mxu1 %vm417_vm0, %v146_v19  ;;  %2316 = vmatpush3.bf16.msra.mxu1 %v2313_v12  ;;  %v130_v41 = vld [vmem:[%s3449_s1 + $0x30] sm:$0xff]  ;;  %v131_v42 = vld [vmem:[%s3449_s1 + $0x38] sm:$0xff]  ;;  %v132_v43 = vld [vmem:[%s3449_s1 + $0x40] sm:$0xff] }
  0x7b   :  { %2318 = vmatprep.subr.bf16.mxu1 %v2317_v22  ;;  %2115 = vmatprep.mubr.msk.f32.mxu0 %vm167_vm1, %v124_v35  ;;  %v133_v44 = vld [vmem:[%s3449_s1 + $0x48] sm:$0xff]  ;;  %v134_v45 = vld [vmem:[%s3449_s1 + $0x50] sm:$0xff]  ;;  %v135_v46 = vld [vmem:[%s3449_s1 + $0x58] sm:$0xff] }
  0x7c   :  { %2308 = vmatpush3.bf16.msra.mxu0 %v2305_v21  ;;  %v136_v47 = vld [vmem:[%s3449_s1 + $0x60] sm:$0xff]  ;;  %v137_v48 = vld [vmem:[%s3449_s1 + $0x68] sm:$0xff]  ;;  %v138_v49 = vld [vmem:[%s3449_s1 + $0x70] sm:$0xff] }
  0x7d   :  { %2151 = vmatmul.mubr.msk.f32.gmra.mrb[6].mxu1 %vm417_vm0, %v147_v23  ;;  %v139_v50 = vld [vmem:[%s3449_s1 + $0x78] sm:$0xff]  ;;  %v1901_v51 = vld [vmem:[%s3453_s5] ss:$0 sm:$0xff]  ;;  %s2595_s1 = smov 96  }
  0x7e   :  { %2153 = vmatprep.mubr.msk.f32.mxu1 %vm417_vm0, %v148_v26  ;;  %2320 = vmatpush3.bf16.msra.mxu1 %v2317_v22 }
  0x7f   :  { %2322 = vmatprep.subr.bf16.mxu1 %v2321_v27  ;;  %2116 = vmatmul.mubr.msk.f32.vlgmr.msra.gmra.mrb[0].mxu0 %vm167_vm1, %v125_v36 }
  0x80   :  { %2118 = vmatprep.mubr.msk.f32.mxu0 %vm167_vm1, %v126_v37 }
  0x81   :  { %2154 = vmatmul.mubr.msk.f32.gmra.mrb[8].mxu1 %vm417_vm0, %v149_v28 }
  0x82   :  { %2156 = vmatprep.mubr.msk.f32.mxu1 %vm417_vm0, %v150_v29  ;;  %2324 = vmatpush3.bf16.msra.mxu1 %v2321_v27 }
  0x83   :  { %2119 = vmatmul.mubr.msk.f32.gmra.mrb[2].mxu0 %vm167_vm1, %v127_v38 }
  0x84   :  { %2121 = vmatprep.mubr.msk.f32.mxu0 %vm167_vm1, %v128_v39 }
  0x85   :  { %2157 = vmatmul.mubr.msk.f32.gmra.mrb[10].mxu1 %vm417_vm0, %v151_v30 }
  0x86   :  { %2159 = vmatprep.mubr.msk.f32.mxu1 %vm417_vm0, %v152_v31 }
  0x87   :  { %2122 = vmatmul.mubr.msk.f32.gmra.mrb[4].mxu0 %vm167_vm1, %v129_v40 }
  0x88   :  { %2124 = vmatprep.mubr.msk.f32.mxu0 %vm167_vm1, %v130_v41 }
  0x89   :  { %2160 = vmatmul.mubr.msk.f32.gmra.mrb[12].mxu1 %vm417_vm0, %v153_v32 }
  0x8a   :  { %2162 = vmatprep.mubr.msk.f32.mxu1 %vm417_vm0, %v154_v33 }
  0x8b   :  { %2125 = vmatmul.mubr.msk.f32.gmra.mrb[6].mxu0 %vm167_vm1, %v131_v42 }
  0x8c   :  { %2127 = vmatprep.mubr.msk.f32.mxu0 %vm167_vm1, %v132_v43 }
  0x8d   :  { %2163 = vmatmul.mubr.msk.f32.gmra.mrb[14].mxu1 %vm417_vm0, %v155_v34 }
  0x8f   :  { %2128 = vmatmul.mubr.msk.f32.gmra.mrb[8].mxu0 %vm167_vm1, %v133_v44 }
  0x90   :  { %2130 = vmatprep.mubr.msk.f32.mxu0 %vm167_vm1, %v134_v45 }
  0x93   :  { %2131 = vmatmul.mubr.msk.f32.gmra.mrb[10].mxu0 %vm167_vm1, %v135_v46 }
  0x94   :  { %2133 = vmatprep.mubr.msk.f32.mxu0 %vm167_vm1, %v136_v47 }
  0x97   :  { %2134 = vmatmul.mubr.msk.f32.gmra.mrb[12].mxu0 %vm167_vm1, %v137_v48 }
  0x98   :  { %2136 = vmatprep.mubr.msk.f32.mxu0 %vm167_vm1, %v138_v49 }
  0x9b   :  { %2137 = vmatmul.mubr.msk.f32.gmra.mrb[14].mxu0 %vm167_vm1, %v139_v50 }
 0x144   :  { %v2143_v52 = vpop.f32.mrb[0].mxu1 }
 0x145   :  { %v538_v53 = vadd.f32 %v2143_v52, %v1901_v51  ;;  %v532_v54 = vpop.f32.mrb[1].mxu1  ;;  %v949_v52 = vld [vmem:[#allocation8 + $0x8] sm:$0xff] }
 0x146   :  { %v533_v55 = vadd.f32 %v1901_v51, %v532_v54 }
 0x147   :  { %v612_v58 = vmax.f32 %v538_v53, 0.0  ;;  %v950_v53 = vld [vmem:[#allocation8 + $0x10] sm:$0xff] }
 0x148   :  { %v611_v56 = vmax.f32 %v533_v55, 0.0  ;;  %v2146_v57 = vpop.f32.mrb[2].mxu1 }
 0x149   :  { %v548_v59 = vadd.f32 %v2146_v57, %v1901_v51  ;;  %v542_v60 = vpop.f32.mrb[3].mxu1 }
 0x14a   :  { %v543_v61 = vadd.f32 %v1901_v51, %v542_v60  ;;  %2181 = vmatprep.mubr.msk.f32.mxu1 %vm642_vm2, %v611_v56  ;;  %v951_v56 = vld [vmem:[#allocation8 + $0x18] sm:$0xff] }
 0x14b   :  { %v614_v62 = vmax.f32 %v548_v59, 0.0  ;;  %2182 = vmatmul.mubr.msk.f32.vlgmr.msra.gmra.mrb[16].mxu1 %vm642_vm2, %v612_v58  ;;  %v2329_v57 = vpack.c.bf16 %v951_v56, %v950_v53  ;;  %v1918_v58 = vld [vmem:[#allocation7] ss:$0 sm:$0xff]  ;;  %v1171_v53 = vld [vmem:[%s3458_s10 + $0x18] sm:$0xff] }
 0x14c   :  { %v613_v63 = vmax.f32 %v543_v61, 0.0  ;;  %v2149_v0 = vpop.f32.mrb[4].mxu1 }
 0x14d   :  { %v558_v1 = vadd.f32 %v2149_v0, %v1901_v51  ;;  %v552_v2 = vpop.f32.mrb[5].mxu1 }
 0x14e   :  { %v553_v3 = vadd.f32 %v1901_v51, %v552_v2  ;;  %2184 = vmatprep.mubr.msk.f32.mxu1 %vm642_vm2, %v613_v63 }
 0x14f   :  { %v616_v4 = vmax.f32 %v558_v1, 0.0  ;;  %2185 = vmatmul.mubr.msk.f32.gmra.mrb[18].mxu1 %vm642_vm2, %v614_v62 }
 0x150   :  { %v615_v5 = vmax.f32 %v553_v3, 0.0  ;;  %v2152_v6 = vpop.f32.mrb[6].mxu1 }
 0x151   :  { %v568_v7 = vadd.f32 %v2152_v6, %v1901_v51  ;;  %v562_v8 = vpop.f32.mrb[7].mxu1 }
 0x152   :  { %v563_v9 = vadd.f32 %v1901_v51, %v562_v8  ;;  %2187 = vmatprep.mubr.msk.f32.mxu1 %vm642_vm2, %v615_v5  ;;  %v2924_v36 = vpop.f32.mrb[0].mxu0 }
 0x153   :  { %v618_v10 = vmax.f32 %v568_v7, 0.0  ;;  %2188 = vmatmul.mubr.msk.f32.gmra.mrb[20].mxu1 %vm642_vm2, %v616_v4  ;;  %v2926_v37 = vpop.f32.mrb[1].mxu0 }
 0x154   :  { %v617_v11 = vmax.f32 %v563_v9, 0.0  ;;  %v2155_v12 = vpop.f32.mrb[8].mxu1 }
 0x155   :  { %v578_v13 = vadd.f32 %v2155_v12, %v1901_v51  ;;  %v572_v14 = vpop.f32.mrb[9].mxu1 }
 0x156   :  { %v573_v15 = vadd.f32 %v1901_v51, %v572_v14  ;;  %2190 = vmatprep.mubr.msk.f32.mxu1 %vm642_vm2, %v617_v11  ;;  %v2928_v38 = vpop.f32.mrb[2].mxu0 }
 0x157   :  { %v620_v16 = vmax.f32 %v578_v13, 0.0  ;;  %2191 = vmatmul.mubr.msk.f32.gmra.mrb[22].mxu1 %vm642_vm2, %v618_v10  ;;  %v2930_v39 = vpop.f32.mrb[3].mxu0 }
 0x158   :  { %v619_v17 = vmax.f32 %v573_v15, 0.0  ;;  %v2158_v18 = vpop.f32.mrb[10].mxu1 }
 0x159   :  { %v588_v19 = vadd.f32 %v2158_v18, %v1901_v51  ;;  %v582_v20 = vpop.f32.mrb[11].mxu1 }
 0x15a   :  { %v583_v21 = vadd.f32 %v1901_v51, %v582_v20  ;;  %2193 = vmatprep.mubr.msk.f32.mxu1 %vm642_vm2, %v619_v17  ;;  %v2932_v40 = vpop.f32.mrb[4].mxu0 }
 0x15b   :  { %v622_v22 = vmax.f32 %v588_v19, 0.0  ;;  %2194 = vmatmul.mubr.msk.f32.gmra.mrb[24].mxu1 %vm642_vm2, %v620_v16  ;;  %v2934_v41 = vpop.f32.mrb[5].mxu0 }
 0x15c   :  { %v621_v23 = vmax.f32 %v583_v21, 0.0  ;;  %v2161_v24 = vpop.f32.mrb[12].mxu1 }
 0x15d   :  { %v598_v25 = vadd.f32 %v2161_v24, %v1901_v51  ;;  %v592_v26 = vpop.f32.mrb[13].mxu1 }
 0x15e   :  { %v593_v27 = vadd.f32 %v1901_v51, %v592_v26  ;;  %2196 = vmatprep.mubr.msk.f32.mxu1 %vm642_vm2, %v621_v23  ;;  %v2936_v42 = vpop.f32.mrb[6].mxu0  ;;  %v3015_v26 = vld [vmem:[%s3451_s3] ss:$0 sm:$0xff] }
 0x15f   :  { %v624_v28 = vmax.f32 %v598_v25, 0.0  ;;  %2197 = vmatmul.mubr.msk.f32.gmra.mrb[26].mxu1 %vm642_vm2, %v622_v22  ;;  %v2938_v43 = vpop.f32.mrb[7].mxu0  ;;  %v3065_v56 = vadd.f32 %v2936_v42, %v3015_v26 }
 0x160   :  { %v623_v29 = vmax.f32 %v593_v27, 0.0  ;;  %v2164_v30 = vpop.f32.mrb[14].mxu1  ;;  %v288_v27 = vadd.f32 %v2924_v36, %v3015_v26 }
 0x161   :  { %v608_v31 = vadd.f32 %v2164_v30, %v1901_v51  ;;  %v602_v32 = vpop.f32.mrb[15].mxu1 }
 0x162   :  { %v603_v33 = vadd.f32 %v1901_v51, %v602_v32  ;;  %2199 = vmatprep.mubr.msk.f32.mxu1 %vm642_vm2, %v623_v29  ;;  %v2940_v44 = vpop.f32.mrb[8].mxu0  ;;  %v948_v51 = vld [vmem:[#allocation8] sm:$0xff]  ;;  %v293_v29 = vadd.f32 %v3015_v26, %v2930_v39  ;;  %v313_v39 = vadd.f32 %v3015_v26, %v2938_v43 }
 0x163   :  { %v626_v34 = vmax.f32 %v608_v31, 0.0  ;;  %2200 = vmatmul.mubr.msk.f32.gmra.mrb[28].mxu1 %vm642_vm2, %v624_v28  ;;  %v2942_v45 = vpop.f32.mrb[9].mxu0  ;;  %v2325_v55 = vpack.c.bf16 %v949_v52, %v948_v51  ;;  %v298_v31 = vadd.f32 %v2928_v38, %v3015_v26  ;;  %v1170_v51 = vld [vmem:[%s3458_s10 + $0x10] sm:$0xff] }
 0x164   :  { %v625_v35 = vmax.f32 %v603_v33, 0.0 }
 0x165   :  { %2326 = vmatprep.subr.bf16.mxu0 %v2325_v55 }
 0x166   :  { %2202 = vmatprep.mubr.msk.f32.mxu1 %vm642_vm2, %v625_v35  ;;  %v2944_v46 = vpop.f32.mrb[10].mxu0  ;;  %2328 = vmatpush3.bf16.msra.mxu0 %v2325_v55  ;;  %v3040_v35 = vadd.f32 %v2932_v40, %v3015_v26  ;;  %v1169_v40 = vld [vmem:[%s3458_s10 + $0x8] sm:$0xff]  ;;  %v2337_v55 = vpack.c.bf16 %v1171_v53, %v1170_v51 }
 0x167   :  { %2203 = vmatmul.mubr.msk.f32.gmra.mrb[30].mxu1 %vm642_vm2, %v626_v34  ;;  %v2946_v47 = vpop.f32.mrb[11].mxu0  ;;  %2330 = vmatprep.subr.bf16.mxu0 %v2329_v57  ;;  %v303_v34 = vadd.f32 %v3015_v26, %v2934_v41  ;;  %v1168_v41 = vld [vmem:[%s3458_s10] sm:$0xff] }
 0x168   :  { %v2333_v52 = vpack.c.bf16 %v1169_v40, %v1168_v41 }
 0x16a   :  { %v2948_v48 = vpop.f32.mrb[12].mxu0  ;;  %2332 = vmatpush3.bf16.msra.mxu0 %v2329_v57  ;;  %2334 = vmatprep.subr.bf16.mxu1 %v2333_v52 }
 0x16b   :  { %v2950_v49 = vpop.f32.mrb[13].mxu0  ;;  %2336 = vmatpush3.bf16.msra.mxu1 %v2333_v52 }
 0x16c   :  { %2338 = vmatprep.subr.bf16.mxu1 %v2337_v55 }
 0x16e   :  { %v2952_v50 = vpop.f32.mrb[14].mxu0 }
 0x16f   :  { %v2954_v54 = vpop.f32.mrb[15].mxu0  ;;  %2340 = vmatpush3.bf16.msra.mxu1 %v2337_v55 }
 0x21e   :  { %v2183_v59 = vpop.f32.mrb[16].mxu1 }
 0x21f   :  { %v757_v60 = vpop.f32.mrb[17].mxu1  ;;  %v2960_v0 = vadd.f32 %v2183_v59, %v1918_v58 }
 0x220   :  { %v2956_v61 = vadd.f32 %v1918_v58, %v757_v60  ;;  %v361_v60 = vlaneseq }
 0x221   :  { %v933_v30 = vadd.f32 %v2960_v0, %v288_v27 }
 0x222   :  { %v2186_v62 = vpop.f32.mrb[18].mxu1  ;;  %868 = vrot.lane.b32.xlu0 %v2956_v61, %s2595_s1  ;;  %v362_v42 = vshrl.u32 %v361_v60, 7 }
 0x223   :  { %v767_v63 = vpop.f32.mrb[19].mxu1  ;;  %v2964_v2 = vadd.f32 %v2186_v62, %v1918_v58  ;;  %v3077_v62 = vadd.f32 %v3015_v26, %v2926_v37 }
 0x224   :  { %v2962_v1 = vadd.f32 %v1918_v58, %v767_v63  ;;  %v363_v63 = vsub.s32 0, %v362_v42 }
 0x225   :  { %v935_v33 = vadd.f32 %v2964_v2, %v298_v31 }
 0x226   :  { %v2189_v3 = vpop.f32.mrb[20].mxu1  ;;  %872 = vrot.lane.b32.xlu1 %v2962_v1, %s2595_s1  ;;  %870 = vrot.lane.b32.xlu0 %v2960_v0, %s2595_s1  ;;  %v934_v32 = vadd.f32 %v2962_v1, %v293_v29 }
 0x227   :  { %v777_v4 = vpop.f32.mrb[21].mxu1  ;;  %v2972_v6 = vadd.f32 %v2189_v3, %v1918_v58  ;;  %v364_v3 = vrot.slane %v3077_v62, %v363_v63 }
 0x228   :  { %v2970_v5 = vadd.f32 %v1918_v58, %v777_v4  ;;  %v368_v4 = vrot.slane %v293_v29, %v363_v63 }
 0x229   :  { %v937_v38 = vadd.f32 %v2972_v6, %v3040_v35 }
 0x22a   :  { %v2192_v7 = vpop.f32.mrb[22].mxu1  ;;  %874 = vrot.lane.b32.xlu1 %v2964_v2, %s2595_s1  ;;  %876 = vrot.lane.b32.xlu0 %v2970_v5, %s2595_s1  ;;  %v936_v36 = vadd.f32 %v2970_v5, %v303_v34 }
 0x22b   :  { %v787_v8 = vpop.f32.mrb[23].mxu1  ;;  %v2980_v10 = vadd.f32 %v2192_v7, %v1918_v58  ;;  %v393_v7 = vsub.f32 %v3077_v62, %v364_v3 }
 0x22c   :  { %v2978_v9 = vadd.f32 %v1918_v58, %v787_v8 }
 0x22d   :  { %v939_v57 = vadd.f32 %v2980_v10, %v3065_v56  ;;  %v836_v8 = vmul.f32 %v2956_v61, %v393_v7  ;;  %v3125_v7 = vadd.f32 %v2948_v48, %v3015_v26  ;;  %v3136_v48 = vadd.f32 %v2952_v50, %v3015_v26 }
 0x22e   :  { %v2195_v11 = vpop.f32.mrb[24].mxu1  ;;  %878 = vrot.lane.b32.xlu1 %v2972_v6, %s2595_s1  ;;  %880 = vrot.lane.b32.xlu0 %v2978_v9, %s2595_s1  ;;  %v938_v43 = vadd.f32 %v2978_v9, %v313_v39 }
 0x22f   :  { %v797_v12 = vpop.f32.mrb[25].mxu1  ;;  %v2988_v14 = vadd.f32 %v2195_v11, %v1918_v58  ;;  %v395_v11 = vsub.f32 %v293_v29, %v368_v4 }
 0x230   :  { %v2986_v13 = vadd.f32 %v1918_v58, %v797_v12  ;;  %v394_v12 = vsub.f32 %v288_v27, %v364_v3  ;;  %v3088_v27 = vadd.f32 %v3015_v26, %v2946_v47  ;;  %v3100_v47 = vadd.f32 %v3015_v26, %v2950_v49 }
 0x231   :  { %v838_v37 = vmul.f32 %v2962_v1, %v395_v11  ;;  %v3110_v49 = vadd.f32 %v2944_v46, %v3015_v26 }
 0x232   :  { %v2198_v15 = vpop.f32.mrb[26].mxu1  ;;  %882 = vrot.lane.b32.xlu1 %v2980_v10, %s2595_s1  ;;  %884 = vrot.lane.b32.xlu0 %v2986_v13, %s2595_s1 }
 0x233   :  { %v807_v16 = vpop.f32.mrb[27].mxu1  ;;  %v2996_v18 = vadd.f32 %v2198_v15, %v1918_v58 }
 0x234   :  { %v2994_v17 = vadd.f32 %v1918_v58, %v807_v16 }
 0x236   :  { %v2201_v19 = vpop.f32.mrb[28].mxu1  ;;  %886 = vrot.lane.b32.xlu1 %v2988_v14, %s2595_s1  ;;  %888 = vrot.lane.b32.xlu0 %v2994_v17, %s2595_s1 }
 0x237   :  { %v817_v20 = vpop.f32.mrb[29].mxu1  ;;  %v3004_v22 = vadd.f32 %v2201_v19, %v1918_v58  ;;  %v396_v19 = vsub.f32 %v298_v31, %v368_v4 }
 0x238   :  { %v3002_v21 = vadd.f32 %v1918_v58, %v817_v20  ;;  %v376_v20 = vrot.slane %v313_v39, %v363_v63 }
 0x239   :  { %v839_v29 = vmul.f32 %v2964_v2, %v396_v19  ;;  %v384_v2 = vrot.slane %v3088_v27, %v363_v63 }
 0x23a   :  { %v2204_v23 = vpop.f32.mrb[30].mxu1  ;;  %890 = vrot.lane.b32.xlu1 %v2996_v18, %s2595_s1  ;;  %892 = vrot.lane.b32.xlu0 %v3002_v21, %s2595_s1  ;;  %v399_v31 = vsub.f32 %v313_v39, %v376_v20  ;;  %v400_v52 = vsub.f32 %v3065_v56, %v376_v20  ;;  %v388_v56 = vrot.slane %v3100_v47, %v363_v63 }
 0x23b   :  { %v827_v24 = vpop.f32.mrb[31].mxu1  ;;  %v3019_v28 = vadd.f32 %v2204_v23, %v1918_v58  ;;  %v837_v23 = vmul.f32 %v2960_v0, %v394_v12  ;;  %v403_v60 = vsub.f32 %v3088_v27, %v384_v2 }
 0x23c   :  { %v3010_v25 = vadd.f32 %v1918_v58, %v827_v24  ;;  %v323_v58 = vadd.f32 %v3015_v26, %v2942_v45  ;;  %v372_v45 = vrot.slane %v303_v34, %v363_v63  ;;  %v842_v39 = vmul.f32 %v2978_v9, %v399_v31 }
 0x23d   :  { %v843_v9 = vmul.f32 %v2980_v10, %v400_v52  ;;  %v406_v20 = vsub.f32 %v3125_v7, %v388_v56 }
 0x23e   :  { %894 = vrot.lane.b32.xlu1 %v3004_v22, %s2595_s1  ;;  %896 = vrot.lane.b32.xlu0 %v3010_v25, %s2595_s1  ;;  %v940_v59 = vadd.f32 %v2986_v13, %v323_v58  ;;  %v397_v24 = vsub.f32 %v303_v34, %v372_v45  ;;  %v398_v41 = vsub.f32 %v3040_v35, %v372_v45 }
 0x23f   :  { %v3096_v35 = vadd.f32 %v2940_v44, %v3015_v26  ;;  %v849_v50 = vmul.f32 %v3004_v22, %v406_v20 }
 0x240   :  { %v840_v1 = vmul.f32 %v2970_v5, %v397_v24  ;;  %v841_v5 = vmul.f32 %v2972_v6, %v398_v41  ;;  %v3116_v6 = vadd.f32 %v3015_v26, %v2954_v54  ;;  %v404_v54 = vsub.f32 %v3110_v49, %v384_v2 }
 0x242   :  { %898 = vrot.lane.b32.xlu1 %v3019_v28, %s2595_s1  ;;  %1566 = vrot.lane.b32.xlu0 %v933_v30, %s2595_s1  ;;  %v392_v45 = vrot.slane %v3116_v6, %v363_v63 }
 0x246   :  { %1568 = vrot.lane.b32.xlu0 %v934_v32, %s2595_s1 }
 0x24a   :  { %1570 = vrot.lane.b32.xlu0 %v935_v33, %s2595_s1 }
 0x24e   :  { %1572 = vrot.lane.b32.xlu0 %v936_v36, %s2595_s1 }
 0x252   :  { %1574 = vrot.lane.b32.xlu0 %v937_v38, %s2595_s1  ;;  %v380_v38 = vrot.slane %v323_v58, %v363_v63  ;;  %v847_v63 = vmul.f32 %v2996_v18, %v404_v54 }
 0x254   :  { %v401_v53 = vsub.f32 %v323_v58, %v380_v38 }
 0x256   :  { %1576 = vrot.lane.b32.xlu0 %v938_v43, %s2595_s1  ;;  %v844_v58 = vmul.f32 %v2986_v13, %v401_v53  ;;  %v846_v13 = vmul.f32 %v2994_v17, %v403_v60 }
 0x25a   :  { %1578 = vrot.lane.b32.xlu0 %v939_v57, %s2595_s1 }
 0x25e   :  { %1580 = vrot.lane.b32.xlu0 %v940_v59, %s2595_s1  ;;  %v402_v59 = vsub.f32 %v3096_v35, %v380_v38 }
 0x260   :  { %v845_v10 = vmul.f32 %v2988_v14, %v402_v59 }
 0x294   :  { %v869_v15 = vpop.permute.xlu0 %868 }
 0x295   :  { %v916_v16 = vadd.f32 %v869_v15, %v836_v8  ;;  %v405_v8 = vsub.f32 %v3100_v47, %v388_v56 }
 0x297   :  { %2213 = vmatprep.mubr.msk.f32.mxu0 %vm167_vm1, %v916_v16  ;;  %v848_v19 = vmul.f32 %v3002_v21, %v405_v8 }
 0x298   :  { %v873_v30 = vpop.permute.xlu1 %872  ;;  %v871_v32 = vpop.permute.xlu0 %870 }
 0x299   :  { %v918_v33 = vadd.f32 %v873_v30, %v838_v37  ;;  %v917_v36 = vadd.f32 %v871_v32, %v837_v23  ;;  %v407_v37 = vsub.f32 %v3116_v6, %v392_v45 }
 0x29b   :  { %2214 = vmatmul.mubr.msk.f32.vlgmr.msra.gmra.mrb[16].mxu0 %vm167_vm1, %v917_v36  ;;  %v850_v26 = vmul.f32 %v3010_v25, %v407_v37 }
 0x29c   :  { %v875_v0 = vpop.permute.xlu1 %874  ;;  %v877_v34 = vpop.permute.xlu0 %876  ;;  %2216 = vmatprep.mubr.msk.f32.mxu0 %vm167_vm1, %v918_v33  ;;  %v408_v33 = vsub.f32 %v3136_v48, %v392_v45 }
 0x29d   :  { %v919_v40 = vadd.f32 %v875_v0, %v839_v29  ;;  %v920_v51 = vadd.f32 %v877_v34, %v840_v1  ;;  %v1935_v34 = vld [vmem:[#allocation10] ss:$0 sm:$0xff] }
 0x29e   :  { %v851_v1 = vmul.f32 %v3019_v28, %v408_v33 }
 0x29f   :  { %2217 = vmatmul.mubr.msk.f32.gmra.mrb[18].mxu0 %vm167_vm1, %v919_v40 }
 0x2a0   :  { %v879_v43 = vpop.permute.xlu1 %878  ;;  %v881_v55 = vpop.permute.xlu0 %880  ;;  %2219 = vmatprep.mubr.msk.f32.mxu0 %vm167_vm1, %v920_v51 }
 0x2a1   :  { %v921_v44 = vadd.f32 %v879_v43, %v841_v5  ;;  %v922_v57 = vadd.f32 %v881_v55, %v842_v39 }
 0x2a3   :  { %2220 = vmatmul.mubr.msk.f32.gmra.mrb[20].mxu0 %vm167_vm1, %v921_v44 }
 0x2a4   :  { %v883_v42 = vpop.permute.xlu1 %882  ;;  %v885_v3 = vpop.permute.xlu0 %884  ;;  %2222 = vmatprep.mubr.msk.f32.mxu0 %vm167_vm1, %v922_v57 }
 0x2a5   :  { %v923_v46 = vadd.f32 %v883_v42, %v843_v9  ;;  %v924_v4 = vadd.f32 %v885_v3, %v844_v58 }
 0x2a7   :  { %2223 = vmatmul.mubr.msk.f32.gmra.mrb[22].mxu0 %vm167_vm1, %v923_v46 }
 0x2a8   :  { %v887_v11 = vpop.permute.xlu1 %886  ;;  %v889_v12 = vpop.permute.xlu0 %888  ;;  %2225 = vmatprep.mubr.msk.f32.mxu0 %vm167_vm1, %v924_v4 }
 0x2a9   :  { %v925_v15 = vadd.f32 %v887_v11, %v845_v10  ;;  %v926_v16 = vadd.f32 %v889_v12, %v846_v13 }
 0x2ab   :  { %2226 = vmatmul.mubr.msk.f32.gmra.mrb[24].mxu0 %vm167_vm1, %v925_v15 }
 0x2ac   :  { %v891_v23 = vpop.permute.xlu1 %890  ;;  %v893_v24 = vpop.permute.xlu0 %892  ;;  %2228 = vmatprep.mubr.msk.f32.mxu0 %vm167_vm1, %v926_v16 }
 0x2ad   :  { %v927_v30 = vadd.f32 %v891_v23, %v847_v63  ;;  %v928_v32 = vadd.f32 %v893_v24, %v848_v19 }
 0x2af   :  { %2229 = vmatmul.mubr.msk.f32.gmra.mrb[26].mxu0 %vm167_vm1, %v927_v30 }
 0x2b0   :  { %v895_v36 = vpop.permute.xlu1 %894  ;;  %v897_v38 = vpop.permute.xlu0 %896  ;;  %2231 = vmatprep.mubr.msk.f32.mxu0 %vm167_vm1, %v928_v32 }
 0x2b1   :  { %v929_v41 = vadd.f32 %v895_v36, %v849_v50  ;;  %v930_v29 = vadd.f32 %v897_v38, %v850_v26 }
 0x2b3   :  { %2232 = vmatmul.mubr.msk.f32.gmra.mrb[28].mxu0 %vm167_vm1, %v929_v41 }
 0x2b4   :  { %v899_v31 = vpop.permute.xlu1 %898  ;;  %2234 = vmatprep.mubr.msk.f32.mxu0 %vm167_vm1, %v930_v29 }
 0x2b5   :  { %v931_v0 = vadd.f32 %v899_v31, %v851_v1 }
 0x2b7   :  { %2235 = vmatmul.mubr.msk.f32.gmra.mrb[30].mxu0 %vm167_vm1, %v931_v0 }
 0x36e   :  { %v2215_v40 = vpop.f32.mrb[16].mxu0 }
 0x36f   :  { %v1079_v51 = vadd.f32 %v2215_v40, %v1935_v34  ;;  %v1073_v52 = vpop.f32.mrb[17].mxu0 }
 0x370   :  { %v1074_v2 = vadd.f32 %v1935_v34, %v1073_v52 }
 0x371   :  { %v1153_v53 = vmax.f32 %v1079_v51, 0.0  ;;  %v1952_v51 = vld [vmem:[%s3459_s11] ss:$0 sm:$0xff] }
 0x372   :  { %v1152_v5 = vmax.f32 %v1074_v2, 0.0  ;;  %v2218_v39 = vpop.f32.mrb[18].mxu0 }
 0x373   :  { %v1089_v43 = vadd.f32 %v2218_v39, %v1935_v34  ;;  %v1083_v55 = vpop.f32.mrb[19].mxu0 }
 0x374   :  { %v1084_v44 = vadd.f32 %v1935_v34, %v1083_v55  ;;  %2245 = vmatprep.mubr.msk.f32.mxu1 %vm167_vm1, %v1152_v5 }
 0x375   :  { %2246 = vmatmul.mubr.msk.f32.vlgmr.msra.gmra.mrb[32].mxu1 %vm167_vm1, %v1153_v53  ;;  %v1155_v59 = vmax.f32 %v1089_v43, 0.0 }
 0x376   :  { %v1154_v57 = vmax.f32 %v1084_v44, 0.0  ;;  %v2221_v56 = vpop.f32.mrb[20].mxu0 }
 0x377   :  { %v1099_v9 = vadd.f32 %v2221_v56, %v1935_v34  ;;  %v1093_v58 = vpop.f32.mrb[21].mxu0 }
 0x378   :  { %v1094_v60 = vadd.f32 %v1935_v34, %v1093_v58  ;;  %2248 = vmatprep.mubr.msk.f32.mxu1 %vm167_vm1, %v1154_v57 }
 0x379   :  { %2249 = vmatmul.mubr.msk.f32.gmra.mrb[34].mxu1 %vm167_vm1, %v1155_v59  ;;  %v1157_v46 = vmax.f32 %v1099_v9, 0.0 }
 0x37a   :  { %v1156_v42 = vmax.f32 %v1094_v60, 0.0  ;;  %v2224_v3 = vpop.f32.mrb[22].mxu0 }
 0x37b   :  { %v1109_v4 = vadd.f32 %v2224_v3, %v1935_v34  ;;  %v1103_v54 = vpop.f32.mrb[23].mxu0 }
 0x37c   :  { %v1104_v45 = vadd.f32 %v1935_v34, %v1103_v54  ;;  %2251 = vmatprep.mubr.msk.f32.mxu1 %vm167_vm1, %v1156_v42 }
 0x37d   :  { %2252 = vmatmul.mubr.msk.f32.gmra.mrb[36].mxu1 %vm167_vm1, %v1157_v46  ;;  %v1159_v8 = vmax.f32 %v1109_v4, 0.0 }
 0x37e   :  { %v1158_v10 = vmax.f32 %v1104_v45, 0.0  ;;  %v2227_v13 = vpop.f32.mrb[24].mxu0 }
 0x37f   :  { %v1119_v11 = vadd.f32 %v2227_v13, %v1935_v34  ;;  %v1113_v12 = vpop.f32.mrb[25].mxu0 }
 0x380   :  { %v1114_v15 = vadd.f32 %v1935_v34, %v1113_v12  ;;  %2254 = vmatprep.mubr.msk.f32.mxu1 %vm167_vm1, %v1158_v10  ;;  %v932_v10 = vadd.f32 %v2956_v61, %v3077_v62 }
 0x381   :  { %2255 = vmatmul.mubr.msk.f32.gmra.mrb[38].mxu1 %vm167_vm1, %v1159_v8  ;;  %v1161_v19 = vmax.f32 %v1119_v11, 0.0 }
 0x382   :  { %v1160_v16 = vmax.f32 %v1114_v15, 0.0  ;;  %v2230_v63 = vpop.f32.mrb[26].mxu0 }
 0x383   :  { %v1129_v20 = vadd.f32 %v2230_v63, %v1935_v34  ;;  %v1123_v37 = vpop.f32.mrb[27].mxu0 }
 0x384   :  { %v1124_v23 = vadd.f32 %v1935_v34, %v1123_v37  ;;  %2257 = vmatprep.mubr.msk.f32.mxu1 %vm167_vm1, %v1160_v16 }
 0x385   :  { %2258 = vmatmul.mubr.msk.f32.gmra.mrb[40].mxu1 %vm167_vm1, %v1161_v19  ;;  %v1163_v32 = vmax.f32 %v1129_v20, 0.0 }
 0x386   :  { %v1162_v24 = vmax.f32 %v1124_v23, 0.0  ;;  %v2233_v30 = vpop.f32.mrb[28].mxu0 }
 0x387   :  { %v1139_v50 = vadd.f32 %v2233_v30, %v1935_v34  ;;  %v1133_v26 = vpop.f32.mrb[29].mxu0 }
 0x388   :  { %v1134_v33 = vadd.f32 %v1935_v34, %v1133_v26  ;;  %2260 = vmatprep.mubr.msk.f32.mxu1 %vm167_vm1, %v1162_v24 }
 0x389   :  { %2261 = vmatmul.mubr.msk.f32.gmra.mrb[42].mxu1 %vm167_vm1, %v1163_v32  ;;  %v1165_v41 = vmax.f32 %v1139_v50, 0.0 }
 0x38a   :  { %v1164_v36 = vmax.f32 %v1134_v33, 0.0  ;;  %v2236_v38 = vpop.f32.mrb[30].mxu0 }
 0x38b   :  { %v1149_v29 = vadd.f32 %v2236_v38, %v1935_v34  ;;  %v1143_v1 = vpop.f32.mrb[31].mxu0 }
 0x38c   :  { %v1144_v31 = vadd.f32 %v1935_v34, %v1143_v1  ;;  %2263 = vmatprep.mubr.msk.f32.mxu1 %vm167_vm1, %v1164_v36 }
 0x38d   :  { %2264 = vmatmul.mubr.msk.f32.gmra.mrb[44].mxu1 %vm167_vm1, %v1165_v41  ;;  %v1167_v40 = vmax.f32 %v1149_v29, 0.0  ;;  %v942_v41 = vadd.f32 %v2994_v17, %v3088_v27  ;;  %v944_v17 = vadd.f32 %v3002_v21, %v3100_v47  ;;  %v941_v21 = vadd.f32 %v2988_v14, %v3096_v35  ;;  %v3254_v47 = vpop.permute.xlu0 %1566 }
 0x38e   :  { %v1166_v0 = vmax.f32 %v1144_v31, 0.0  ;;  %v943_v31 = vadd.f32 %v2996_v18, %v3110_v49 }
 0x390   :  { %2266 = vmatprep.mubr.msk.f32.mxu1 %vm167_vm1, %v1166_v0 }
 0x391   :  { %2267 = vmatmul.mubr.msk.f32.gmra.mrb[46].mxu1 %vm167_vm1, %v1167_v40  ;;  %v945_v40 = vadd.f32 %v3004_v22, %v3125_v7 }
 0x448   :  { %v2247_v52 = vpop.f32.mrb[32].mxu1 }
 0x449   :  { %v3172_v2 = vadd.f32 %v2247_v52, %v1952_v51  ;;  %v1293_v5 = vpop.f32.mrb[33].mxu1 }
 0x44a   :  { %v3174_v39 = vadd.f32 %v1952_v51, %v1293_v5 }
 0x44b   :  { %v1375_v34 = vsel %vm167_vm1, %v3172_v2, -inf }
 0x44c   :  { %1376 = vmax.xlane.f32.xlu1 %v1375_v34  ;;  %v2250_v53 = vpop.f32.mrb[34].mxu1  ;;  %v1372_v43 = vsel %vm167_vm1, %v3174_v39, -inf }
 0x44d   :  { %v3180_v55 = vadd.f32 %v2250_v53, %v1952_v51  ;;  %v1303_v44 = vpop.f32.mrb[35].mxu1  ;;  %1373 = vmax.xlane.f32.xlu0 %v1372_v43 }
 0x44e   :  { %v3184_v56 = vadd.f32 %v1952_v51, %v1303_v44 }
 0x44f   :  { %v1381_v57 = vsel %vm167_vm1, %v3180_v55, -inf }
 0x450   :  { %v2253_v59 = vpop.f32.mrb[36].mxu1  ;;  %v1378_v42 = vsel %vm167_vm1, %v3184_v56, -inf }
 0x451   :  { %v1313_v9 = vpop.f32.mrb[37].mxu1  ;;  %1382 = vmax.xlane.f32.xlu0 %v1381_v57  ;;  %v3186_v58 = vadd.f32 %v2253_v59, %v1952_v51 }
 0x452   :  { %v3221_v33 = vadd.f32 %v1952_v51, %v1313_v9 }
 0x453   :  { %v1387_v54 = vsel %vm167_vm1, %v3186_v58, -inf }
 0x454   :  { %v2256_v60 = vpop.f32.mrb[38].mxu1  ;;  %v1384_v38 = vsel %vm167_vm1, %v3221_v33, -inf }
 0x455   :  { %v1323_v3 = vpop.f32.mrb[39].mxu1  ;;  %1379 = vmax.xlane.f32.xlu0 %v1378_v42  ;;  %v3190_v46 = vadd.f32 %v2256_v60, %v1952_v51 }
 0x456   :  { %v3223_v36 = vadd.f32 %v1952_v51, %v1323_v3 }
 0x457   :  { %v1393_v11 = vsel %vm167_vm1, %v3190_v46, -inf }
 0x458   :  { %v2259_v4 = vpop.f32.mrb[40].mxu1  ;;  %v1390_v1 = vsel %vm167_vm1, %v3223_v36, -inf }
 0x459   :  { %v1333_v45 = vpop.f32.mrb[41].mxu1  ;;  %1388 = vmax.xlane.f32.xlu0 %v1387_v54  ;;  %v3196_v13 = vadd.f32 %v2259_v4, %v1952_v51 }
 0x45a   :  { %v3230_v29 = vadd.f32 %v1952_v51, %v1333_v45 }
 0x45b   :  { %v1399_v19 = vsel %vm167_vm1, %v3196_v13, -inf }
 0x45c   :  { %v2262_v8 = vpop.f32.mrb[42].mxu1  ;;  %v1396_v0 = vsel %vm167_vm1, %v3230_v29, -inf }
 0x45d   :  { %1564 = vrot.lane.b32.xlu1 %v932_v10, %s2595_s1  ;;  %v1343_v12 = vpop.f32.mrb[43].mxu1  ;;  %1394 = vmax.xlane.f32.xlu0 %v1393_v11  ;;  %v3203_v16 = vadd.f32 %v2262_v8, %v1952_v51 }
 0x45e   :  { %v3201_v15 = vadd.f32 %v1952_v51, %v1343_v12 }
 0x45f   :  { %v1405_v23 = vsel %vm167_vm1, %v3203_v16, -inf }
 0x460   :  { %v2265_v63 = vpop.f32.mrb[44].mxu1  ;;  %v1402_v27 = vsel %vm167_vm1, %v3201_v15, -inf }
 0x461   :  { %v1353_v20 = vpop.f32.mrb[45].mxu1  ;;  %1400 = vmax.xlane.f32.xlu0 %v1399_v19  ;;  %v3209_v62 = vadd.f32 %v2265_v63, %v1952_v51 }
 0x462   :  { %v3207_v61 = vadd.f32 %v1952_v51, %v1353_v20 }
 0x463   :  { %v1411_v50 = vsel %vm167_vm1, %v3209_v62, -inf }
 0x464   :  { %v2268_v37 = vpop.f32.mrb[46].mxu1  ;;  %v1408_v18 = vsel %vm167_vm1, %v3207_v61, -inf }
 0x465   :  { %v1363_v24 = vpop.f32.mrb[47].mxu1  ;;  %1406 = vmax.xlane.f32.xlu0 %v1405_v23  ;;  %v3215_v32 = vadd.f32 %v2268_v37, %v1952_v51 }
 0x466   :  { %v3213_v30 = vadd.f32 %v1952_v51, %v1363_v24  ;;  %v3256_v51 = vpop.permute.xlu0 %1568 }
 0x467   :  { %v1417_v26 = vsel %vm167_vm1, %v3215_v32, -inf }
 0x468   :  { %v1414_v49 = vsel %vm167_vm1, %v3213_v30, -inf }
 0x469   :  { %1412 = vmax.xlane.f32.xlu0 %v1411_v50 }
 0x46a   :  { %v3258_v22 = vpop.permute.xlu0 %1570 }
 0x46d   :  { %1418 = vmax.xlane.f32.xlu0 %v1417_v26 }
 0x46e   :  { %v3260_v7 = vpop.permute.xlu0 %1572 }
 0x472   :  { %v3262_v52 = vpop.permute.xlu0 %1574 }
 0x476   :  { %v3264_v5 = vpop.permute.xlu0 %1576 }
 0x47a   :  { %v3266_v34 = vpop.permute.xlu0 %1578 }
 0x47e   :  { %v3268_v53 = vpop.permute.xlu0 %1580 }
 0x481   :  { %1385 = vmax.xlane.f32.xlu1 %v1384_v38 }
 0x483   :  { %1584 = vrot.lane.b32.xlu0 %v942_v41, %s2595_s1 }
 0x485   :  { %1391 = vmax.xlane.f32.xlu1 %v1390_v1 }
 0x487   :  { %1586 = vrot.lane.b32.xlu0 %v943_v31, %s2595_s1 }
 0x489   :  { %1397 = vmax.xlane.f32.xlu1 %v1396_v0 }
 0x48b   :  { %1588 = vrot.lane.b32.xlu0 %v944_v17, %s2595_s1 }
 0x48d   :  { %1403 = vmax.xlane.f32.xlu1 %v1402_v27 }
 0x48f   :  { %1590 = vrot.lane.b32.xlu0 %v945_v40, %s2595_s1 }
 0x491   :  { %1409 = vmax.xlane.f32.xlu1 %v1408_v18  ;;  %v1644_v18 = vld [vmem:[#allocation11] sm:$0xff] }
 0x495   :  { %1415 = vmax.xlane.f32.xlu1 %v1414_v49  ;;  %v1645_v49 = vld [vmem:[#allocation11 + $0x8] sm:$0xff] }
 0x4a6   :  { %1582 = vrot.lane.b32.xlu1 %v941_v21, %s2595_s1 }
 0x4d9   :  { %v1377_v43 = vpop.xlane.xlu1 %1376 }
 0x4da   :  { %v1421_v14 = vsub.f32 %v3172_v2, %v1377_v43  ;;  %v1374_v35 = vpop.xlane.xlu0 %1373 }
 0x4db   :  { %v1420_v44 = vsub.f32 %v3174_v39, %v1374_v35  ;;  %v1647_v35 = vld [vmem:[#allocation11 + $0x18] sm:$0xff] }
 0x4dc   :  { %v1438_v57 = vmul.f32 1.442695, %v1421_v14  ;;  %v1646_v14 = vld [vmem:[#allocation11 + $0x10] sm:$0xff] }
 0x4dd   :  { %v1436_v59 = vmul.f32 1.442695, %v1420_v44 }
 0x4de   :  { %2359 = vpow2.f32 %v1438_v57  ;;  %v1383_v9 = vpop.xlane.xlu0 %1382  ;;  %v2345_v57 = vpack.c.bf16 %v1647_v35, %v1646_v14 }
 0x4df   :  { %2361 = vpow2.f32 %v1436_v59  ;;  %v1423_v60 = vsub.f32 %v3180_v55, %v1383_v9  ;;  %v3315_v9 = vpop.permute.xlu1 %1564 }
 0x4e1   :  { %v1442_v42 = vmul.f32 1.442695, %v1423_v60 }
 0x4e2   :  { %v1380_v3 = vpop.xlane.xlu0 %1379 }
 0x4e3   :  { %2363 = vpow2.f32 %v1442_v42  ;;  %v1422_v4 = vsub.f32 %v3184_v56, %v1380_v3 }
 0x4e5   :  { %v1440_v54 = vmul.f32 1.442695, %v1422_v4 }
 0x4e6   :  { %v1389_v45 = vpop.xlane.xlu0 %1388 }
 0x4e7   :  { %2365 = vpow2.f32 %v1440_v54  ;;  %v1425_v2 = vsub.f32 %v3186_v58, %v1389_v45 }
 0x4e8   :  { %v3275_v10 = vpop.eup %2359 }
 0x4e9   :  { %v3277_v39 = vpop.eup %2361  ;;  %v1446_v8 = vmul.f32 1.442695, %v1425_v2  ;;  %v1471_v11 = vsel %vm167_vm1, %v3275_v10, 0.0 }
 0x4ea   :  { %1472 = vadd.xlane.f32.xlu0 %v1471_v11  ;;  %v1395_v55 = vpop.xlane.xlu0 %1394  ;;  %v1468_v12 = vsel %vm167_vm1, %v3277_v39, 0.0 }
 0x4eb   :  { %2367 = vpow2.f32 %v1446_v8  ;;  %v1427_v56 = vsub.f32 %v3190_v46, %v1395_v55  ;;  %1469 = vadd.xlane.f32.xlu1 %v1468_v12 }
 0x4ed   :  { %v3284_v63 = vpop.eup %2363  ;;  %v1450_v58 = vmul.f32 1.442695, %v1427_v56 }
 0x4ee   :  { %v1401_v19 = vpop.xlane.xlu0 %1400  ;;  %v1477_v20 = vsel %vm167_vm1, %v3284_v63, 0.0 }
 0x4ef   :  { %2369 = vpow2.f32 %v1450_v58  ;;  %v1429_v37 = vsub.f32 %v3196_v13, %v1401_v19  ;;  %1478 = vadd.xlane.f32.xlu0 %v1477_v20 }
 0x4f1   :  { %v3289_v23 = vpop.eup %2365  ;;  %v1454_v24 = vmul.f32 1.442695, %v1429_v37 }
 0x4f2   :  { %v1407_v50 = vpop.xlane.xlu0 %1406  ;;  %v1474_v26 = vsel %vm167_vm1, %v3289_v23, 0.0 }
 0x4f3   :  { %2371 = vpow2.f32 %v1454_v24  ;;  %v1431_v46 = vsub.f32 %v3203_v16, %v1407_v50  ;;  %1475 = vadd.xlane.f32.xlu1 %v1474_v26 }
 0x4f5   :  { %v3294_v38 = vpop.eup %2367  ;;  %v1458_v41 = vmul.f32 1.442695, %v1431_v46 }
 0x4f6   :  { %v1413_v1 = vpop.xlane.xlu0 %1412  ;;  %v1483_v31 = vsel %vm167_vm1, %v3294_v38, 0.0 }
 0x4f7   :  { %2373 = vpow2.f32 %v1458_v41  ;;  %v1433_v13 = vsub.f32 %v3209_v62, %v1413_v1  ;;  %1484 = vadd.xlane.f32.xlu0 %v1483_v31  ;;  %v2341_v62 = vpack.c.bf16 %v1645_v49, %v1644_v18  ;;  %v946_v49 = vadd.f32 %v3010_v25, %v3116_v6 }
 0x4f9   :  { %v3299_v0 = vpop.eup %2369  ;;  %v1462_v17 = vmul.f32 1.442695, %v1433_v13  ;;  %2342 = vmatprep.subr.bf16.mxu0 %v2341_v62 }
 0x4fa   :  { %v1489_v27 = vsel %vm167_vm1, %v3299_v0, 0.0  ;;  %2344 = vmatpush3.bf16.msra.mxu0 %v2341_v62  ;;  %v1419_v55 = vpop.xlane.xlu0 %1418  ;;  %v947_v62 = vadd.f32 %v3019_v28, %v3136_v48 }
 0x4fb   :  { %2375 = vpow2.f32 %v1462_v17  ;;  %1490 = vadd.xlane.f32.xlu0 %v1489_v27  ;;  %2346 = vmatprep.subr.bf16.mxu0 %v2345_v57 }
 0x4fd   :  { %v3303_v16 = vpop.eup %2371 }
 0x4fe   :  { %v1495_v40 = vsel %vm167_vm1, %v3303_v16, 0.0  ;;  %2348 = vmatpush3.bf16.msra.mxu0 %v2345_v57 }
 0x4ff   :  { %1496 = vadd.xlane.f32.xlu0 %v1495_v40 }
 0x501   :  { %v3307_v21 = vpop.eup %2373 }
 0x502   :  { %v1501_v43 = vsel %vm167_vm1, %v3307_v21, 0.0 }
 0x503   :  { %1502 = vadd.xlane.f32.xlu0 %v1501_v43  ;;  %v3358_v43 = vpop.permute.xlu0 %1584 }
 0x505   :  { %v3311_v44 = vpop.eup %2375 }
 0x506   :  { %v1507_v59 = vsel %vm167_vm1, %v3311_v44, 0.0 }
 0x507   :  { %1508 = vadd.xlane.f32.xlu0 %v1507_v59  ;;  %v3360_v14 = vpop.permute.xlu0 %1586 }
 0x50b   :  { %v3362_v35 = vpop.permute.xlu0 %1588 }
 0x50e   :  { %v1386_v60 = vpop.xlane.xlu1 %1385 }
 0x50f   :  { %v1424_v42 = vsub.f32 %v3221_v33, %v1386_v60  ;;  %v1435_v33 = vsub.f32 %v3215_v32, %v1419_v55  ;;  %v3364_v57 = vpop.permute.xlu0 %1590 }
 0x511   :  { %v1444_v3 = vmul.f32 1.442695, %v1424_v42  ;;  %v1466_v24 = vmul.f32 1.442695, %v1435_v33 }
 0x512   :  { %v1392_v4 = vpop.xlane.xlu1 %1391 }
 0x513   :  { %2377 = vpow2.f32 %v1444_v3  ;;  %v1426_v54 = vsub.f32 %v3223_v36, %v1392_v4 }
 0x515   :  { %v1448_v45 = vmul.f32 1.442695, %v1426_v54 }
 0x516   :  { %v1398_v2 = vpop.xlane.xlu1 %1397 }
 0x517   :  { %2379 = vpow2.f32 %v1448_v45  ;;  %v1428_v8 = vsub.f32 %v3230_v29, %v1398_v2 }
 0x519   :  { %v1452_v11 = vmul.f32 1.442695, %v1428_v8 }
 0x51a   :  { %v1404_v12 = vpop.xlane.xlu1 %1403 }
 0x51b   :  { %2381 = vpow2.f32 %v1452_v11  ;;  %v1430_v56 = vsub.f32 %v3201_v15, %v1404_v12 }
 0x51d   :  { %v3321_v58 = vpop.eup %2377  ;;  %v1456_v19 = vmul.f32 1.442695, %v1430_v56 }
 0x51e   :  { %v1410_v20 = vpop.xlane.xlu1 %1409  ;;  %v1480_v36 = vsel %vm167_vm1, %v3321_v58, 0.0 }
 0x51f   :  { %2383 = vpow2.f32 %v1456_v19  ;;  %v1432_v37 = vsub.f32 %v3207_v61, %v1410_v20  ;;  %1481 = vadd.xlane.f32.xlu1 %v1480_v36 }
 0x521   :  { %v3327_v29 = vpop.eup %2379  ;;  %v1460_v50 = vmul.f32 1.442695, %v1432_v37 }
 0x522   :  { %v1416_v26 = vpop.xlane.xlu1 %1415  ;;  %v1486_v15 = vsel %vm167_vm1, %v3327_v29, 0.0 }
 0x523   :  { %2385 = vpow2.f32 %v1460_v50  ;;  %v1434_v32 = vsub.f32 %v3213_v30, %v1416_v26  ;;  %1487 = vadd.xlane.f32.xlu1 %v1486_v15 }
 0x524   :  { %2387 = vpow2.f32 %v1466_v24 }
 0x525   :  { %v3332_v46 = vpop.eup %2381  ;;  %v1464_v41 = vmul.f32 1.442695, %v1434_v32 }
 0x526   :  { %v1492_v61 = vsel %vm167_vm1, %v3332_v46, 0.0  ;;  %v3366_v59 = vpop.permute.xlu1 %1582 }
 0x527   :  { %2389 = vpow2.f32 %v1464_v41  ;;  %1493 = vadd.xlane.f32.xlu1 %v1492_v61 }
 0x529   :  { %v3336_v1 = vpop.eup %2383 }
 0x52a   :  { %v1498_v31 = vsel %vm167_vm1, %v3336_v1, 0.0 }
 0x52b   :  { %1499 = vadd.xlane.f32.xlu1 %v1498_v31 }
 0x52d   :  { %v3340_v13 = vpop.eup %2385 }
 0x52e   :  { %v1504_v30 = vsel %vm167_vm1, %v3340_v13, 0.0  ;;  %v3344_v17 = vpop.eup %2387 }
 0x52f   :  { %1505 = vadd.xlane.f32.xlu1 %v1504_v30  ;;  %v1513_v18 = vsel %vm167_vm1, %v3344_v17, 0.0 }
 0x531   :  { %v3346_v27 = vpop.eup %2389 }
 0x532   :  { %v1510_v40 = vsel %vm167_vm1, %v3346_v27, 0.0 }
 0x533   :  { %1511 = vadd.xlane.f32.xlu0 %v1510_v40  ;;  %1514 = vadd.xlane.f32.xlu1 %v1513_v18 }
 0x544   :  { %1592 = vrot.lane.b32.xlu1 %v946_v49, %s2595_s1 }
 0x549   :  { %1594 = vrot.lane.b32.xlu0 %v947_v62, %s2595_s1 }
 0x577   :  { %v1473_v60 = vpop.xlane.xlu0 %1472 }
 0x578   :  { %2391 = vrcp.f32 %v1473_v60  ;;  %v1470_v25 = vpop.xlane.xlu1 %1469 }
 0x579   :  { %2393 = vrcp.f32 %v1470_v25 }
 0x57c   :  { %v1479_v6 = vpop.xlane.xlu0 %1478 }
 0x57d   :  { %2395 = vrcp.f32 %v1479_v6 }
 0x580   :  { %v1476_v42 = vpop.xlane.xlu1 %1475 }
 0x581   :  { %2397 = vrcp.f32 %v1476_v42 }
 0x582   :  { %v2392_v28 = vpop.eup %2391 }
 0x583   :  { %v2394_v48 = vpop.eup %2393  ;;  %v1533_v3 = vmul.f32 %v2392_v28, %v3275_v10 }
 0x584   :  { %v1532_v4 = vmul.f32 %v2394_v48, %v3277_v39 }
 0x585   :  { %v1613_v54 = vmul.f32 %v3254_v47, %v1533_v3 }
 0x586   :  { %v1612_v45 = vmul.f32 %v3315_v9, %v1532_v4  ;;  %v1485_v9 = vpop.xlane.xlu0 %1484 }
 0x587   :  { %v2396_v2 = vpop.eup %2395  ;;  %v1629_v11 = vmax.f32 %v1613_v54, 0.0  ;;  %2399 = vrcp.f32 %v1485_v9 }
 0x588   :  { %v1628_v8 = vmax.f32 %v1612_v45, 0.0  ;;  %v1535_v55 = vmul.f32 %v2396_v2, %v3284_v63 }
 0x58a   :  { %2277 = vmatprep.mubr.msk.f32.mxu0 %vm167_vm1, %v1628_v8  ;;  %v1615_v10 = vmul.f32 %v3258_v22, %v1535_v55  ;;  %v1491_v19 = vpop.xlane.xlu0 %1490 }
 0x58b   :  { %v2398_v12 = vpop.eup %2397  ;;  %2278 = vmatmul.mubr.msk.f32.vlgmr.msra.gmra.mrb[32].mxu0 %vm167_vm1, %v1629_v11  ;;  %2401 = vrcp.f32 %v1491_v19 }
 0x58c   :  { %v1534_v56 = vmul.f32 %v2398_v12, %v3289_v23  ;;  %v1631_v47 = vmax.f32 %v1615_v10, 0.0 }
 0x58e   :  { %v1614_v39 = vmul.f32 %v3256_v51, %v1534_v56  ;;  %v1497_v63 = vpop.xlane.xlu0 %1496 }
 0x590   :  { %v1630_v33 = vmax.f32 %v1614_v39, 0.0 }
 0x591   :  { %v2400_v22 = vpop.eup %2399 }
 0x592   :  { %2280 = vmatprep.mubr.msk.f32.mxu0 %vm167_vm1, %v1630_v33  ;;  %v1503_v36 = vpop.xlane.xlu0 %1502  ;;  %v1537_v24 = vmul.f32 %v2400_v22, %v3294_v38 }
 0x593   :  { %2281 = vmatmul.mubr.msk.f32.gmra.mrb[34].mxu0 %vm167_vm1, %v1631_v47 }
 0x594   :  { %v1617_v41 = vmul.f32 %v3262_v52, %v1537_v24 }
 0x595   :  { %v2402_v50 = vpop.eup %2401 }
 0x596   :  { %v1509_v37 = vpop.xlane.xlu0 %1508  ;;  %v1539_v61 = vmul.f32 %v2402_v50, %v3299_v0  ;;  %v1633_v38 = vmax.f32 %v1617_v41, 0.0 }
 0x598   :  { %v1619_v60 = vmul.f32 %v3266_v34, %v1539_v61 }
 0x5ac   :  { %v1482_v20 = vpop.xlane.xlu1 %1481 }
 0x5ad   :  { %2403 = vrcp.f32 %v1482_v20 }
 0x5ae   :  { %2405 = vrcp.f32 %v1497_v63 }
 0x5b0   :  { %v1488_v23 = vpop.xlane.xlu1 %1487 }
 0x5b1   :  { %2407 = vrcp.f32 %v1488_v23 }
 0x5b2   :  { %2409 = vrcp.f32 %v1503_v36 }
 0x5b4   :  { %v1494_v51 = vpop.xlane.xlu1 %1493 }
 0x5b5   :  { %2411 = vrcp.f32 %v1494_v51 }
 0x5b6   :  { %2413 = vrcp.f32 %v1509_v37 }
 0x5b7   :  { %v2404_v26 = vpop.eup %2403 }
 0x5b8   :  { %v1500_v15 = vpop.xlane.xlu1 %1499  ;;  %v1536_v32 = vmul.f32 %v2404_v26, %v3321_v58  ;;  %v2406_v31 = vpop.eup %2405 }
 0x5b9   :  { %2415 = vrcp.f32 %v1500_v15  ;;  %v1541_v25 = vmul.f32 %v2406_v31, %v3303_v16 }
 0x5ba   :  { %v1616_v30 = vmul.f32 %v3260_v7, %v1536_v32 }
 0x5bb   :  { %v2408_v40 = vpop.eup %2407  ;;  %v1621_v48 = vmul.f32 %v3366_v59, %v1541_v25 }
 0x5bc   :  { %v1506_v18 = vpop.xlane.xlu1 %1505  ;;  %v1632_v49 = vmax.f32 %v1616_v30, 0.0  ;;  %v1538_v62 = vmul.f32 %v2408_v40, %v3327_v29  ;;  %v2410_v58 = vpop.eup %2409  ;;  %v1635_v29 = vmax.f32 %v1619_v60, 0.0 }
 0x5bd   :  { %2417 = vrcp.f32 %v1506_v18  ;;  %v1543_v34 = vmul.f32 %v2410_v58, %v3307_v21  ;;  %v1637_v45 = vmax.f32 %v1621_v48, 0.0 }
 0x5be   :  { %2283 = vmatprep.mubr.msk.f32.mxu0 %vm167_vm1, %v1632_v49  ;;  %v1618_v52 = vmul.f32 %v3264_v5, %v1538_v62 }
 0x5bf   :  { %v2412_v0 = vpop.eup %2411  ;;  %2284 = vmatmul.mubr.msk.f32.gmra.mrb[36].mxu0 %vm167_vm1, %v1633_v38 }
 0x5c0   :  { %v1515_v7 = vpop.xlane.xlu1 %1514  ;;  %v1512_v6 = vpop.xlane.xlu0 %1511  ;;  %v1634_v42 = vmax.f32 %v1618_v52, 0.0  ;;  %v1540_v28 = vmul.f32 %v2412_v0, %v3332_v46  ;;  %v1623_v46 = vmul.f32 %v3360_v14, %v1543_v34 }
 0x5c1   :  { %2419 = vrcp.f32 %v1515_v7  ;;  %v2414_v16 = vpop.eup %2413 }
 0x5c2   :  { %2421 = vrcp.f32 %v1512_v6  ;;  %2286 = vmatprep.mubr.msk.f32.mxu0 %vm167_vm1, %v1634_v42  ;;  %v1620_v5 = vmul.f32 %v3268_v53, %v1540_v28  ;;  %v1545_v2 = vmul.f32 %v2414_v16, %v3311_v44  ;;  %v1639_v11 = vmax.f32 %v1623_v46, 0.0 }
 0x5c3   :  { %v2416_v3 = vpop.eup %2415  ;;  %2287 = vmatmul.mubr.msk.f32.gmra.mrb[38].mxu0 %vm167_vm1, %v1635_v29 }
 0x5c4   :  { %v1636_v4 = vmax.f32 %v1620_v5, 0.0  ;;  %v1542_v54 = vmul.f32 %v2416_v3, %v3336_v1  ;;  %v1625_v55 = vmul.f32 %v3364_v57, %v1545_v2  ;;  %v1595_v10 = vpop.permute.xlu0 %1594  ;;  %v1593_v33 = vpop.permute.xlu1 %1592 }
 0x5c6   :  { %2289 = vmatprep.mubr.msk.f32.mxu0 %vm167_vm1, %v1636_v4  ;;  %v1622_v21 = vmul.f32 %v3358_v43, %v1542_v54  ;;  %v1641_v39 = vmax.f32 %v1625_v55, 0.0 }
 0x5c7   :  { %v2418_v59 = vpop.eup %2417  ;;  %2290 = vmatmul.mubr.msk.f32.gmra.mrb[40].mxu0 %vm167_vm1, %v1637_v45 }
 0x5c8   :  { %v1638_v8 = vmax.f32 %v1622_v21, 0.0  ;;  %v1544_v53 = vmul.f32 %v2418_v59, %v3340_v13 }
 0x5ca   :  { %2292 = vmatprep.mubr.msk.f32.mxu0 %vm167_vm1, %v1638_v8  ;;  %v1624_v1 = vmul.f32 %v3362_v35, %v1544_v53 }
 0x5cb   :  { %v2420_v14 = vpop.eup %2419  ;;  %2293 = vmatmul.mubr.msk.f32.gmra.mrb[42].mxu0 %vm167_vm1, %v1639_v11 }
 0x5cc   :  { %v2422_v44 = vpop.eup %2421  ;;  %v1547_v12 = vmul.f32 %v2420_v14, %v3344_v17  ;;  %v1640_v43 = vmax.f32 %v1624_v1, 0.0  ;;  %v1969_v17 = vld [vmem:[%s3461_s13] ss:$0 sm:$0xff]  ;;  %s2596_s13 = smov [#allocation13]  }
 0x5cd   :  { %v1546_v56 = vmul.f32 %v2422_v44, %v3346_v27  ;;  %s1869_s20 = sshll.u32 %s2596_s13, 4  ;;  %s1870_s20 = int_to_ptr.vmem [resolvable:$true] %s1869_s20 }
 0x5ce   :  { %v1627_v13 = vmul.f32 %v1595_v10, %v1547_v12  ;;  %2295 = vmatprep.mubr.msk.f32.mxu0 %vm167_vm1, %v1640_v43  ;;  %s2555_s15 = scalar_lea.vmem %s1870_s20, 2048  ;;  %p2560_p7 = scmp.lt.s32.totalorder %s1870_s20, %s1870_s20 }
 0x5cf   :  { %v1626_v57 = vmul.f32 %v1593_v33, %v1546_v56  ;;  %2296 = vmatmul.mubr.msk.f32.gmra.mrb[44].mxu0 %vm167_vm1, %v1641_v39  ;;  %p2556_p6 = scmp.ne.s32.totalorder %s1870_s20, %s2555_s15  ;;  %p2561_p8 = scmp.lt.s32.totalorder %s2555_s15, %s2555_s15 }
 0x5d0   :  { %v1643_v47 = vmax.f32 %v1627_v13, 0.0 }
 0x5d1   :  { %v1642_v35 = vmax.f32 %v1626_v57, 0.0  ;;  %p2562_p9 = por %p2561_p8, %p2560_p7 }
 0x5d3   :  { %2298 = vmatprep.mubr.msk.f32.mxu0 %vm167_vm1, %v1642_v35  ;;  %p2563_p10 = pnand %p2562_p9, %p2556_p6 }
 0x5d4   :  { %2299 = vmatmul.mubr.msk.f32.gmra.mrb[46].mxu0 %vm167_vm1, %v1643_v47 }
 0x65e   :  { %v2279_v27 = vpop.f32.mrb[32].mxu0 }
 0x65f   :  { %v1775_v9 = vadd.f32 %v2279_v27, %v1969_v17  ;;  %v1769_v19 = vpop.f32.mrb[33].mxu0 }
 0x660   :  { %v1770_v63 = vadd.f32 %v1969_v17, %v1769_v19 }
 0x661   :  { %1849 = vst.msk [vmem:[#allocation13 + $0x8] sm:$0xff] %vm167_vm1, %v1775_v9 }
 0x662   :  { %1848 = vst.msk [vmem:[#allocation13] sm:$0xff] %vm167_vm1, %v1770_v63 }
 0x666   :  { %v2282_v20 = vpop.f32.mrb[34].mxu0 }
 0x667   :  { %v1785_v36 = vadd.f32 %v2282_v20, %v1969_v17  ;;  %v1779_v23 = vpop.f32.mrb[35].mxu0 }
 0x668   :  { %v1780_v22 = vadd.f32 %v1969_v17, %v1779_v23 }
 0x669   :  { %1851 = vst.msk [vmem:[#allocation13 + $0x18] sm:$0xff] %vm167_vm1, %v1785_v36 }
 0x66a   :  { %1850 = vst.msk [vmem:[#allocation13 + $0x10] sm:$0xff] %vm167_vm1, %v1780_v22 }
 0x692   :  { %v2285_v51 = vpop.f32.mrb[36].mxu0 }
 0x693   :  { %v1795_v37 = vadd.f32 %v2285_v51, %v1969_v17  ;;  %v1789_v24 = vpop.f32.mrb[37].mxu0 }
 0x694   :  { %v1790_v50 = vadd.f32 %v1969_v17, %v1789_v24 }
 0x695   :  { %1853 = vst.msk [vmem:[#allocation13 + $0x28] sm:$0xff] %vm167_vm1, %v1795_v37 }
 0x696   :  { %1852 = vst.msk [vmem:[#allocation13 + $0x20] sm:$0xff] %vm167_vm1, %v1790_v50  ;;  %v2288_v26 = vpop.f32.mrb[38].mxu0 }
 0x697   :  { %v1805_v15 = vadd.f32 %v2288_v26, %v1969_v17  ;;  %v1799_v32 = vpop.f32.mrb[39].mxu0 }
 0x698   :  { %v1800_v41 = vadd.f32 %v1969_v17, %v1799_v32 }
 0x699   :  { %1855 = vst.msk [vmem:[#allocation13 + $0x38] sm:$0xff] %vm167_vm1, %v1805_v15 }
 0x69a   :  { %1854 = vst.msk [vmem:[#allocation13 + $0x30] sm:$0xff] %vm167_vm1, %v1800_v41  ;;  %v2291_v61 = vpop.f32.mrb[40].mxu0 }
 0x69b   :  { %v1815_v31 = vadd.f32 %v2291_v61, %v1969_v17  ;;  %v1809_v30 = vpop.f32.mrb[41].mxu0 }
 0x69c   :  { %v1810_v40 = vadd.f32 %v1969_v17, %v1809_v30 }
 0x69d   :  { %1857 = vst.msk [vmem:[#allocation13 + $0x48] sm:$0xff] %vm167_vm1, %v1815_v31 }
 0x69e   :  { %1856 = vst.msk [vmem:[#allocation13 + $0x40] sm:$0xff] %vm167_vm1, %v1810_v40  ;;  %v2294_v18 = vpop.f32.mrb[42].mxu0 }
 0x69f   :  { %v1825_v49 = vadd.f32 %v2294_v18, %v1969_v17  ;;  %v1819_v62 = vpop.f32.mrb[43].mxu0 }
 0x6a0   :  { %v1820_v38 = vadd.f32 %v1969_v17, %v1819_v62 }
 0x6a1   :  { %1859 = vst.msk [vmem:[#allocation13 + $0x58] sm:$0xff] %vm167_vm1, %v1825_v49 }
 0x6a2   :  { %1858 = vst.msk [vmem:[#allocation13 + $0x50] sm:$0xff] %vm167_vm1, %v1820_v38  ;;  %v2297_v60 = vpop.f32.mrb[44].mxu0 }
 0x6a3   :  { %v1835_v25 = vadd.f32 %v2297_v60, %v1969_v17  ;;  %v1829_v58 = vpop.f32.mrb[45].mxu0 }
 0x6a4   :  { %v1830_v52 = vadd.f32 %v1969_v17, %v1829_v58 }
 0x6a5   :  { %1861 = vst.msk [vmem:[#allocation13 + $0x68] sm:$0xff] %vm167_vm1, %v1835_v25 }
 0x6a6   :  { %1860 = vst.msk [vmem:[#allocation13 + $0x60] sm:$0xff] %vm167_vm1, %v1830_v52 }
 0x6a7   :  { %v2300_v0 = vpop.f32.mrb[46].mxu0 }
 0x6a8   :  { %v1845_v7 = vadd.f32 %v2300_v0, %v1969_v17  ;;  %v1839_v6 = vpop.f32.mrb[47].mxu0 }
 0x6a9   :  { %v1840_v42 = vadd.f32 %v1969_v17, %v1839_v6 }
 0x6aa   :  { %1863 = vst.msk [vmem:[#allocation13 + $0x78] sm:$0xff] %vm167_vm1, %v1845_v7 }
 0x6ab   :  { %1862 = vst.msk [vmem:[#allocation13 + $0x70] sm:$0xff] %vm167_vm1, %v1840_v42 }
 0x6ac   :  { %2566 = shalt.err (!%p2563_p10)
}
 0x6ad   :  { %s2567_s28 = scalar_lea.hbm %s3462_s14, 2048 }
 0x6ae   :  { %p2568_p11 = scmp.ne.s32.totalorder %s3462_s14, %s2567_s28  ;;  %p2571_p12 = scmp.lt.u32.totalorder %s2567_s28, %s3462_s14 }
 0x6b0   :  { %p2573_p13 = pnand %p2571_p12, %p2568_p11 }
 0x6b2   :  { %2576 = shalt.err (!%p2573_p13)
}
 0x6b3   :  { %1875 = dma.vmem_to_hbm [thread:$0]  %s1870_s20, 2048, %s3462_s14, [#allocation4], %s2590_s30, %s2590_s30, %s2591_s21  }
 0x6b4   :  { %2585 = dma.done.wait [#allocation4], 2048  }
 0x6b5   :  { %2586 = vsyncadd [#allocation4], 4294965248 }
 0x6b6   :  { %1879 = vsyncpa [#allocation3], 1 }
 0x6b7   :  { %1880 = vsyncpa [#allocation6], 1 }
 0x6b8   :  { %1881 = vsyncpa [#allocation9], 1 }
 0x6b9   :  { %1882 = vsyncpa [#allocation12], 1 }
 0x6ba   :  { %1883 = vsyncpa [#allocation4], 1 }

</bundles_post_ra>
